<compile_context>
chip_gen: v7x
topology: tpu7x:2x2x1
jax: 0.10.0
libtpu: 0.0.40
codegen_flags: <defaults>
</compile_context>

<pallas_src>
import numpy as np
import jax
import jax.numpy as jnp
from jax.experimental import pallas as pl
from jax.experimental.pallas import tpu as pltpu


# ----------------------------- Pallas kernel --------------------------------
def _make_cbam_kernel(C, Cr, W, ksz, HW, HWp, padded):
    pad_k = ksz // 2
    inv_hw = 1.0 / float(HW)
    inv_c = 1.0 / float(C)

    def kernel(x_ref, w1_ref, w2_ref, mw_ref, bias_ref, o_ref):
        # x_ref:  (C, HWp) input        w1_ref: (Cr, C)      w2_ref: (C, Cr)
        # mw_ref: (ksz*ksz, 2, HWp) masked tap weights (row0 -> max map, row1 -> avg)
        # bias_ref: (1, HWp) lane bias (0 at real positions, -big at pad lanes)
        x = x_ref[...].astype(jnp.float32)                      # (C, HWp)

        # --- channel attention: global max / avg pool over spatial (lane reduces) ---
        if padded:
            xm = x + bias_ref[...]            # suppress pad lanes for the max only
        else:
            xm = x
        max_p = jnp.max(xm, axis=1, keepdims=True)              # (C, 1)
        avg_p = jnp.sum(x, axis=1, keepdims=True) * inv_hw      # (C, 1)

        # Shared MLP (1x1 conv -> ReLU -> 1x1 conv, no bias) on the MXU. The second
        # layer is linear, so it is applied once to relu(h_max) + relu(h_avg).
        pools = jnp.concatenate([max_p, avg_p], axis=1)         # (C, 2)
        h = jnp.maximum(
            jnp.dot(w1_ref[...], pools, preferred_element_type=jnp.float32), 0.0)  # (Cr, 2)
        hsum = jnp.sum(h, axis=1, keepdims=True)                # (Cr, 1)
        ch_att = jax.nn.sigmoid(
            jnp.dot(w2_ref[...], hsum, preferred_element_type=jnp.float32))        # (C, 1)
        x2 = x * ch_att                                         # (C, HWp)

        # --- spatial attention: max / mean over channels (sublane reduces) ---
        cmax = jnp.max(x2, axis=0, keepdims=True)               # (1, HWp)
        cavg = jnp.sum(x2, axis=0, keepdims=True) * inv_c       # (1, HWp)
        maps = jnp.concatenate([cmax, cavg], axis=0)            # (2, HWp)

        # 7x7 zero-padded conv as 49 shifted-accumulates in flat (h*W + w) space.
        # One roll per tap covers BOTH maps; validity masks + tap weights are fused in
        # mw_ref; 7 independent per-row partials break the accumulator dependence chain.
        partials = []
        for di in range(-pad_k, pad_k + 1):
            acc = None
            for dj in range(-pad_k, pad_k + 1):
                tap = (di + pad_k) * ksz + (dj + pad_k)
                shift = (-(di * W + dj)) % HWp                  # static int
                if shift:
                    rolled = pltpu.roll(maps, shift=shift, axis=1)  # rolled[p]=maps[p+off]
                else:
                    rolled = maps
                contrib = rolled * mw_ref[tap]                  # (2, HWp)
                acc = contrib if acc is None else acc + contrib
            partials.append(acc)
        while len(partials) > 1:                                # balanced tree sum
            nxt = [partials[i] + partials[i + 1] for i in range(0, len(partials) - 1, 2)]
            if len(partials) % 2:
                nxt.append(partials[-1])
            partials = nxt
        conv = jnp.sum(partials[0], axis=0, keepdims=True)      # (1, HWp)

        sp_att = jax.nn.sigmoid(conv)                           # (1, HWp)
        o_ref[...] = (x2 * sp_att).astype(o_ref.dtype)

    return kernel


# --------------------------------- wrapper ----------------------------------
def cbam_pallas(x, w1, w2, wconv):
    """x: (B, C, H, W) NCHW. w1: (Cr, C), w2: (C, Cr), wconv: (1, 2, k, k)."""
    B, C, H, W = x.shape
    HW = H * W
    HWp = max(128, ((HW + 127) // 128) * 128)       # lane-dense (multiple of 128)
    padded = HWp != HW
    Cr = w1.shape[0]
    ksz = wconv.shape[-1]
    pad_k = ksz // 2
    K2 = ksz * ksz

    xf = jnp.reshape(x, (B, C, HW))
    if padded:
        xf = jnp.pad(xf, ((0, 0), (0, 0), (0, HWp - HW)))       # zero-pad lanes
    w1 = jnp.asarray(w1, jnp.float32)                           # (Cr, C)
    w2 = jnp.asarray(w2, jnp.float32)                           # (C, Cr)

    # Host-precomputed masked tap weights: mw[tap, 0/1, p] = conv weight for the
    # max/avg map at tap (di, dj), zeroed where the source (h+di, w+dj) falls outside
    # the image or where p is a pad lane. Vectorized numpy, 49 iterations total.
    wk = np.asarray(wconv, np.float32).reshape(2, ksz, ksz)     # [max_map, avg_map]
    pos = np.arange(HWp)
    hh, ww = pos // W, pos % W
    dest_ok = pos < HW
    mw = np.zeros((K2, 2, HWp), np.float32)
    for di in range(-pad_k, pad_k + 1):
        h_ok = (hh + di >= 0) & (hh + di < H)
        for dj in range(-pad_k, pad_k + 1):
            tap = (di + pad_k) * ksz + (dj + pad_k)
            ok = dest_ok & h_ok & (ww + dj >= 0) & (ww + dj < W)
            mw[tap, 0] = np.where(ok, wk[0, di + pad_k, dj + pad_k], 0.0)
            mw[tap, 1] = np.where(ok, wk[1, di + pad_k, dj + pad_k], 0.0)
    mw = jnp.asarray(mw)

    # Lane bias protecting the spatial max pool from zero-padded lanes.
    neg_bias = jnp.asarray(
        np.where(dest_ok, 0.0, -3.0e38).astype(np.float32).reshape(1, HWp))

    cost = pl.CostEstimate(
        flops=B * (4 * K2 * HWp + 8 * C * HWp + 4 * C * Cr),
        transcendentals=B * (C + HWp),
        bytes_accessed=2 * B * C * HWp * 4 + (2 * K2 * HWp + 2 * C * Cr + HWp) * 4,
    )

    kernel = _make_cbam_kernel(C, Cr, W, ksz, HW, HWp, padded)
    out = pl.pallas_call(
        kernel,
        out_shape=jax.ShapeDtypeStruct((B, C, HWp), x.dtype),
        grid_spec=pltpu.PrefetchScalarGridSpec(
            num_scalar_prefetch=0,
            grid=(B,),
            in_specs=[
                pl.BlockSpec((None, C, HWp), lambda b: (b, 0, 0)),      # x (squeezed B)
                pl.BlockSpec((Cr, C), lambda b: (0, 0),
                             pipeline_mode=pl.Buffered(1)),             # W1
                pl.BlockSpec((C, Cr), lambda b: (0, 0),
                             pipeline_mode=pl.Buffered(1)),             # W2
                pl.BlockSpec((K2, 2, HWp), lambda b: (0, 0, 0),
                             pipeline_mode=pl.Buffered(1)),             # masked taps
                pl.BlockSpec((1, HWp), lambda b: (0, 0),
                             pipeline_mode=pl.Buffered(1)),             # lane bias
            ],
            out_specs=pl.BlockSpec((None, C, HWp), lambda b: (b, 0, 0)),
        ),
        compiler_params=pltpu.CompilerParams(dimension_semantics=("parallel",)),
        cost_estimate=cost,
    )(xf, w1, w2, mw, neg_bias)

    return out[..., :HW].reshape(B, C, H, W)


# ------------------------------ pure-JAX reference ---------------------------
def cbam_ref(x, w1, w2, wconv):
    ksz = wconv.shape[-1]
    p = ksz // 2
    max_p = jnp.max(x, axis=(2, 3), keepdims=True)
    avg_p = jnp.mean(x, axis=(2, 3), keepdims=True)

    def mlp(t):
        h = jnp.maximum(jnp.einsum('rc,bcij->brij', w1, t), 0.0)
        return jnp.einsum('cr,brij->bcij', w2, h)

    ch = jax.nn.sigmoid(mlp(max_p) + mlp(avg_p))
    x2 = ch * x
    cmax = jnp.max(x2, axis=1, keepdims=True)
    cavg = jnp.mean(x2, axis=1, keepdims=True)
    maps = jnp.concatenate([cmax, cavg], axis=1)
    conv = jax.lax.conv_general_dilated(
        maps, wconv, window_strides=(1, 1), padding=[(p, p), (p, p)],
        dimension_numbers=('NCHW', 'OIHW', 'NCHW'))
    return jax.nn.sigmoid(conv) * x2


# ----------------------------------- main ------------------------------------
if __name__ == "__main__":
    B, C, H, W = 2, 32, 16, 16
    reduction, ksz = 16, 7
    Cr = C // reduction

    key = jax.random.PRNGKey(0)
    k1, k2, k3, kx = jax.random.split(key, 4)
    w1 = jax.random.normal(k1, (Cr, C), jnp.float32) * 0.1               # Conv2d(C, Cr, 1)
    w2 = jax.random.normal(k2, (C, Cr), jnp.float32) * 0.1               # Conv2d(Cr, C, 1)
    wconv = jax.random.normal(k3, (1, 2, ksz, ksz), jnp.float32) * 0.05  # Conv2d(2,1,7,pad=3)
    x = jax.random.normal(kx, (B, C, H, W), jnp.float32)

    out = jax.block_until_ready(cbam_pallas(x, w1, w2, wconv))
    ref = jax.block_until_ready(cbam_ref(x, w1, w2, wconv))
    np.testing.assert_allclose(np.asarray(out), np.asarray(ref), rtol=1e-3, atol=1e-3)

    print("KERNEL_OK")
</pallas_src>

<mosaic_0001>
module attributes {stable_mosaic.version = 11 : i64} {
  func.func @kernel(%arg0: i32, %arg1: memref<1x32x256xf32, #tpu.memory_space<vmem>>, %arg2: memref<2x32xf32, #tpu.memory_space<vmem>>, %arg3: memref<32x2xf32, #tpu.memory_space<vmem>>, %arg4: memref<49x2x256xf32, #tpu.memory_space<vmem>>, %arg5: memref<1x256xf32, #tpu.memory_space<vmem>>, %arg6: memref<1x32x256xf32, #tpu.memory_space<vmem>>) attributes {dimension_semantics = [#tpu.dimension_semantics<parallel>], iteration_bounds = array<i64: 2>, scalar_prefetch = 0 : i64, scratch_operands = 0 : i64, tpu.core_type = #tpu.core_type<tc>, window_params = [{transform_indices = @transform_0, window_bounds = array<i64: 1, 32, 256>}, {pipeline_mode = #tpu.pipeline_mode<synchronous>, transform_indices = @transform_1, window_bounds = array<i64: 2, 32>}, {pipeline_mode = #tpu.pipeline_mode<synchronous>, transform_indices = @transform_2, window_bounds = array<i64: 32, 2>}, {pipeline_mode = #tpu.pipeline_mode<synchronous>, transform_indices = @transform_3, window_bounds = array<i64: 49, 2, 256>}, {pipeline_mode = #tpu.pipeline_mode<synchronous>, transform_indices = @transform_4, window_bounds = array<i64: 1, 256>}, {transform_indices = @transform_5, window_bounds = array<i64: 1, 32, 256>}]} {
    %c0 = arith.constant 0 : index
    %c0_0 = arith.constant 0 : index
    %c0_1 = arith.constant 0 : index
    %0 = vector.load %arg1[%c0, %c0_0, %c0_1] : memref<1x32x256xf32, #tpu.memory_space<vmem>>, vector<1x32x256xf32>
    %1 = vector.shape_cast %0 : vector<1x32x256xf32> to vector<32x256xf32>
    %cst = arith.constant dense<0xFF800000> : vector<32xf32>
    %2 = vector.multi_reduction <maximumf>, %1, %cst [1] : vector<32x256xf32> to vector<32xf32>
    %3 = vector.shape_cast %2 : vector<32xf32> to vector<32x1xf32>
    %cst_2 = arith.constant dense<0.000000e+00> : vector<32xf32>
    %4 = vector.multi_reduction <add>, %1, %cst_2 [1] : vector<32x256xf32> to vector<32xf32>
    %5 = vector.shape_cast %4 : vector<32xf32> to vector<32x1xf32>
    %cst_3 = arith.constant 3.906250e-03 : f32
    %6 = vector.broadcast %cst_3 : f32 to vector<32x1xf32>
    %7 = arith.mulf %5, %6 : vector<32x1xf32>
    %8 = tpu.concatenate %3, %7 in 1 : vector<32x1xf32>, vector<32x1xf32> -> vector<32x2xf32>
    %c0_4 = arith.constant 0 : index
    %c0_5 = arith.constant 0 : index
    %9 = vector.load %arg2[%c0_4, %c0_5] : memref<2x32xf32, #tpu.memory_space<vmem>>, vector<2x32xf32>
    %cst_6 = arith.constant dense<0.000000e+00> : vector<2x2xf32>
    %10 = tpu.matmul %9, %8, %cst_6 {dimension_numbers = #tpu.dot_dimension_numbers<[1], [0], [0], [1], [0, 0, 1, 1], [], []>} : vector<2x32xf32>, vector<32x2xf32>, vector<2x2xf32> -> vector<2x2xf32>
    %cst_7 = arith.constant 0.000000e+00 : f32
    %11 = vector.broadcast %cst_7 : f32 to vector<2x2xf32>
    %12 = arith.maximumf %10, %11 : vector<2x2xf32>
    %cst_8 = arith.constant dense<0.000000e+00> : vector<2xf32>
    %13 = vector.multi_reduction <add>, %12, %cst_8 [1] : vector<2x2xf32> to vector<2xf32>
    %14 = vector.shape_cast %13 : vector<2xf32> to vector<2x1xf32>
    %c0_9 = arith.constant 0 : index
    %c0_10 = arith.constant 0 : index
    %15 = vector.load %arg3[%c0_9, %c0_10] : memref<32x2xf32, #tpu.memory_space<vmem>>, vector<32x2xf32>
    %cst_11 = arith.constant dense<0.000000e+00> : vector<32x1xf32>
    %16 = tpu.matmul %15, %14, %cst_11 {dimension_numbers = #tpu.dot_dimension_numbers<[1], [0], [0], [1], [0, 0, 1, 1], [], []>} : vector<32x2xf32>, vector<2x1xf32>, vector<32x1xf32> -> vector<32x1xf32>
    %17 = arith.negf %16 : vector<32x1xf32>
    %18 = math.exp %17 : vector<32x1xf32>
    %cst_12 = arith.constant 1.000000e+00 : f32
    %19 = vector.broadcast %cst_12 : f32 to vector<32x1xf32>
    %20 = arith.addf %19, %18 : vector<32x1xf32>
    %21 = arith.divf %19, %20 : vector<32x1xf32>
    %22 = vector.broadcast %21 : vector<32x1xf32> to vector<32x256xf32>
    %23 = arith.mulf %1, %22 : vector<32x256xf32>
    %cst_13 = arith.constant dense<0xFF800000> : vector<256xf32>
    %24 = vector.multi_reduction <maximumf>, %23, %cst_13 [0] : vector<32x256xf32> to vector<256xf32>
    %25 = vector.shape_cast %24 : vector<256xf32> to vector<1x256xf32>
    %cst_14 = arith.constant dense<0.000000e+00> : vector<256xf32>
    %26 = vector.multi_reduction <add>, %23, %cst_14 [0] : vector<32x256xf32> to vector<256xf32>
    %27 = vector.shape_cast %26 : vector<256xf32> to vector<1x256xf32>
    %cst_15 = arith.constant 3.125000e-02 : f32
    %28 = vector.broadcast %cst_15 : f32 to vector<1x256xf32>
    %29 = arith.mulf %27, %28 : vector<1x256xf32>
    %30 = tpu.concatenate %25, %29 in 0 : vector<1x256xf32>, vector<1x256xf32> -> vector<2x256xf32>
    %c51_i32 = arith.constant 51 : i32
    %31 = tpu.dynamic_rotate %30 by %c51_i32 dim 1 : vector<2x256xf32>, i32 -> vector<2x256xf32>
    %c0_16 = arith.constant 0 : index
    %c0_17 = arith.constant 0 : index
    %c0_18 = arith.constant 0 : index
    %32 = vector.load %arg4[%c0_16, %c0_17, %c0_18] : memref<49x2x256xf32, #tpu.memory_space<vmem>>, vector<1x2x256xf32>
    %33 = vector.shape_cast %32 : vector<1x2x256xf32> to vector<2x256xf32>
    %34 = arith.mulf %31, %33 : vector<2x256xf32>
    %c50_i32 = arith.constant 50 : i32
    %35 = tpu.dynamic_rotate %30 by %c50_i32 dim 1 : vector<2x256xf32>, i32 -> vector<2x256xf32>
    %c1 = arith.constant 1 : index
    %c0_19 = arith.constant 0 : index
    %c0_20 = arith.constant 0 : index
    %36 = vector.load %arg4[%c1, %c0_19, %c0_20] : memref<49x2x256xf32, #tpu.memory_space<vmem>>, vector<1x2x256xf32>
    %37 = vector.shape_cast %36 : vector<1x2x256xf32> to vector<2x256xf32>
    %38 = arith.mulf %35, %37 : vector<2x256xf32>
    %39 = arith.addf %34, %38 : vector<2x256xf32>
    %c49_i32 = arith.constant 49 : i32
    %40 = tpu.dynamic_rotate %30 by %c49_i32 dim 1 : vector<2x256xf32>, i32 -> vector<2x256xf32>
    %c2 = arith.constant 2 : index
    %c0_21 = arith.constant 0 : index
    %c0_22 = arith.constant 0 : index
    %41 = vector.load %arg4[%c2, %c0_21, %c0_22] : memref<49x2x256xf32, #tpu.memory_space<vmem>>, vector<1x2x256xf32>
    %42 = vector.shape_cast %41 : vector<1x2x256xf32> to vector<2x256xf32>
    %43 = arith.mulf %40, %42 : vector<2x256xf32>
    %44 = arith.addf %39, %43 : vector<2x256xf32>
    %c48_i32 = arith.constant 48 : i32
    %45 = tpu.dynamic_rotate %30 by %c48_i32 dim 1 : vector<2x256xf32>, i32 -> vector<2x256xf32>
    %c3 = arith.constant 3 : index
    %c0_23 = arith.constant 0 : index
    %c0_24 = arith.constant 0 : index
    %46 = vector.load %arg4[%c3, %c0_23, %c0_24] : memref<49x2x256xf32, #tpu.memory_space<vmem>>, vector<1x2x256xf32>
    %47 = vector.shape_cast %46 : vector<1x2x256xf32> to vector<2x256xf32>
    %48 = arith.mulf %45, %47 : vector<2x256xf32>
    %49 = arith.addf %44, %48 : vector<2x256xf32>
    %c47_i32 = arith.constant 47 : i32
    %50 = tpu.dynamic_rotate %30 by %c47_i32 dim 1 : vector<2x256xf32>, i32 -> vector<2x256xf32>
    %c4 = arith.constant 4 : index
    %c0_25 = arith.constant 0 : index
    %c0_26 = arith.constant 0 : index
    %51 = vector.load %arg4[%c4, %c0_25, %c0_26] : memref<49x2x256xf32, #tpu.memory_space<vmem>>, vector<1x2x256xf32>
    %52 = vector.shape_cast %51 : vector<1x2x256xf32> to vector<2x256xf32>
    %53 = arith.mulf %50, %52 : vector<2x256xf32>
    %54 = arith.addf %49, %53 : vector<2x256xf32>
    %c46_i32 = arith.constant 46 : i32
    %55 = tpu.dynamic_rotate %30 by %c46_i32 dim 1 : vector<2x256xf32>, i32 -> vector<2x256xf32>
    %c5 = arith.constant 5 : index
    %c0_27 = arith.constant 0 : index
    %c0_28 = arith.constant 0 : index
    %56 = vector.load %arg4[%c5, %c0_27, %c0_28] : memref<49x2x256xf32, #tpu.memory_space<vmem>>, vector<1x2x256xf32>
    %57 = vector.shape_cast %56 : vector<1x2x256xf32> to vector<2x256xf32>
    %58 = arith.mulf %55, %57 : vector<2x256xf32>
    %59 = arith.addf %54, %58 : vector<2x256xf32>
    %c45_i32 = arith.constant 45 : i32
    %60 = tpu.dynamic_rotate %30 by %c45_i32 dim 1 : vector<2x256xf32>, i32 -> vector<2x256xf32>
    %c6 = arith.constant 6 : index
    %c0_29 = arith.constant 0 : index
    %c0_30 = arith.constant 0 : index
    %61 = vector.load %arg4[%c6, %c0_29, %c0_30] : memref<49x2x256xf32, #tpu.memory_space<vmem>>, vector<1x2x256xf32>
    %62 = vector.shape_cast %61 : vector<1x2x256xf32> to vector<2x256xf32>
    %63 = arith.mulf %60, %62 : vector<2x256xf32>
    %64 = arith.addf %59, %63 : vector<2x256xf32>
    %c35_i32 = arith.constant 35 : i32
    %65 = tpu.dynamic_rotate %30 by %c35_i32 dim 1 : vector<2x256xf32>, i32 -> vector<2x256xf32>
    %c7 = arith.constant 7 : index
    %c0_31 = arith.constant 0 : index
    %c0_32 = arith.constant 0 : index
    %66 = vector.load %arg4[%c7, %c0_31, %c0_32] : memref<49x2x256xf32, #tpu.memory_space<vmem>>, vector<1x2x256xf32>
    %67 = vector.shape_cast %66 : vector<1x2x256xf32> to vector<2x256xf32>
    %68 = arith.mulf %65, %67 : vector<2x256xf32>
    %c34_i32 = arith.constant 34 : i32
    %69 = tpu.dynamic_rotate %30 by %c34_i32 dim 1 : vector<2x256xf32>, i32 -> vector<2x256xf32>
    %c8 = arith.constant 8 : index
    %c0_33 = arith.constant 0 : index
    %c0_34 = arith.constant 0 : index
    %70 = vector.load %arg4[%c8, %c0_33, %c0_34] : memref<49x2x256xf32, #tpu.memory_space<vmem>>, vector<1x2x256xf32>
    %71 = vector.shape_cast %70 : vector<1x2x256xf32> to vector<2x256xf32>
    %72 = arith.mulf %69, %71 : vector<2x256xf32>
    %73 = arith.addf %68, %72 : vector<2x256xf32>
    %c33_i32 = arith.constant 33 : i32
    %74 = tpu.dynamic_rotate %30 by %c33_i32 dim 1 : vector<2x256xf32>, i32 -> vector<2x256xf32>
    %c9 = arith.constant 9 : index
    %c0_35 = arith.constant 0 : index
    %c0_36 = arith.constant 0 : index
    %75 = vector.load %arg4[%c9, %c0_35, %c0_36] : memref<49x2x256xf32, #tpu.memory_space<vmem>>, vector<1x2x256xf32>
    %76 = vector.shape_cast %75 : vector<1x2x256xf32> to vector<2x256xf32>
    %77 = arith.mulf %74, %76 : vector<2x256xf32>
    %78 = arith.addf %73, %77 : vector<2x256xf32>
    %c32_i32 = arith.constant 32 : i32
    %79 = tpu.dynamic_rotate %30 by %c32_i32 dim 1 : vector<2x256xf32>, i32 -> vector<2x256xf32>
    %c10 = arith.constant 10 : index
    %c0_37 = arith.constant 0 : index
    %c0_38 = arith.constant 0 : index
    %80 = vector.load %arg4[%c10, %c0_37, %c0_38] : memref<49x2x256xf32, #tpu.memory_space<vmem>>, vector<1x2x256xf32>
    %81 = vector.shape_cast %80 : vector<1x2x256xf32> to vector<2x256xf32>
    %82 = arith.mulf %79, %81 : vector<2x256xf32>
    %83 = arith.addf %78, %82 : vector<2x256xf32>
    %c31_i32 = arith.constant 31 : i32
    %84 = tpu.dynamic_rotate %30 by %c31_i32 dim 1 : vector<2x256xf32>, i32 -> vector<2x256xf32>
    %c11 = arith.constant 11 : index
    %c0_39 = arith.constant 0 : index
    %c0_40 = arith.constant 0 : index
    %85 = vector.load %arg4[%c11, %c0_39, %c0_40] : memref<49x2x256xf32, #tpu.memory_space<vmem>>, vector<1x2x256xf32>
    %86 = vector.shape_cast %85 : vector<1x2x256xf32> to vector<2x256xf32>
    %87 = arith.mulf %84, %86 : vector<2x256xf32>
    %88 = arith.addf %83, %87 : vector<2x256xf32>
    %c30_i32 = arith.constant 30 : i32
    %89 = tpu.dynamic_rotate %30 by %c30_i32 dim 1 : vector<2x256xf32>, i32 -> vector<2x256xf32>
    %c12 = arith.constant 12 : index
    %c0_41 = arith.constant 0 : index
    %c0_42 = arith.constant 0 : index
    %90 = vector.load %arg4[%c12, %c0_41, %c0_42] : memref<49x2x256xf32, #tpu.memory_space<vmem>>, vector<1x2x256xf32>
    %91 = vector.shape_cast %90 : vector<1x2x256xf32> to vector<2x256xf32>
    %92 = arith.mulf %89, %91 : vector<2x256xf32>
    %93 = arith.addf %88, %92 : vector<2x256xf32>
    %c29_i32 = arith.constant 29 : i32
    %94 = tpu.dynamic_rotate %30 by %c29_i32 dim 1 : vector<2x256xf32>, i32 -> vector<2x256xf32>
    %c13 = arith.constant 13 : index
    %c0_43 = arith.constant 0 : index
    %c0_44 = arith.constant 0 : index
    %95 = vector.load %arg4[%c13, %c0_43, %c0_44] : memref<49x2x256xf32, #tpu.memory_space<vmem>>, vector<1x2x256xf32>
    %96 = vector.shape_cast %95 : vector<1x2x256xf32> to vector<2x256xf32>
    %97 = arith.mulf %94, %96 : vector<2x256xf32>
    %98 = arith.addf %93, %97 : vector<2x256xf32>
    %c19_i32 = arith.constant 19 : i32
    %99 = tpu.dynamic_rotate %30 by %c19_i32 dim 1 : vector<2x256xf32>, i32 -> vector<2x256xf32>
    %c14 = arith.constant 14 : index
    %c0_45 = arith.constant 0 : index
    %c0_46 = arith.constant 0 : index
    %100 = vector.load %arg4[%c14, %c0_45, %c0_46] : memref<49x2x256xf32, #tpu.memory_space<vmem>>, vector<1x2x256xf32>
    %101 = vector.shape_cast %100 : vector<1x2x256xf32> to vector<2x256xf32>
    %102 = arith.mulf %99, %101 : vector<2x256xf32>
    %c18_i32 = arith.constant 18 : i32
    %103 = tpu.dynamic_rotate %30 by %c18_i32 dim 1 : vector<2x256xf32>, i32 -> vector<2x256xf32>
    %c15 = arith.constant 15 : index
    %c0_47 = arith.constant 0 : index
    %c0_48 = arith.constant 0 : index
    %104 = vector.load %arg4[%c15, %c0_47, %c0_48] : memref<49x2x256xf32, #tpu.memory_space<vmem>>, vector<1x2x256xf32>
    %105 = vector.shape_cast %104 : vector<1x2x256xf32> to vector<2x256xf32>
    %106 = arith.mulf %103, %105 : vector<2x256xf32>
    %107 = arith.addf %102, %106 : vector<2x256xf32>
    %c17_i32 = arith.constant 17 : i32
    %108 = tpu.dynamic_rotate %30 by %c17_i32 dim 1 : vector<2x256xf32>, i32 -> vector<2x256xf32>
    %c16 = arith.constant 16 : index
    %c0_49 = arith.constant 0 : index
    %c0_50 = arith.constant 0 : index
    %109 = vector.load %arg4[%c16, %c0_49, %c0_50] : memref<49x2x256xf32, #tpu.memory_space<vmem>>, vector<1x2x256xf32>
    %110 = vector.shape_cast %109 : vector<1x2x256xf32> to vector<2x256xf32>
    %111 = arith.mulf %108, %110 : vector<2x256xf32>
    %112 = arith.addf %107, %111 : vector<2x256xf32>
    %c16_i32 = arith.constant 16 : i32
    %113 = tpu.dynamic_rotate %30 by %c16_i32 dim 1 : vector<2x256xf32>, i32 -> vector<2x256xf32>
    %c17 = arith.constant 17 : index
    %c0_51 = arith.constant 0 : index
    %c0_52 = arith.constant 0 : index
    %114 = vector.load %arg4[%c17, %c0_51, %c0_52] : memref<49x2x256xf32, #tpu.memory_space<vmem>>, vector<1x2x256xf32>
    %115 = vector.shape_cast %114 : vector<1x2x256xf32> to vector<2x256xf32>
    %116 = arith.mulf %113, %115 : vector<2x256xf32>
    %117 = arith.addf %112, %116 : vector<2x256xf32>
    %c15_i32 = arith.constant 15 : i32
    %118 = tpu.dynamic_rotate %30 by %c15_i32 dim 1 : vector<2x256xf32>, i32 -> vector<2x256xf32>
    %c18 = arith.constant 18 : index
    %c0_53 = arith.constant 0 : index
    %c0_54 = arith.constant 0 : index
    %119 = vector.load %arg4[%c18, %c0_53, %c0_54] : memref<49x2x256xf32, #tpu.memory_space<vmem>>, vector<1x2x256xf32>
    %120 = vector.shape_cast %119 : vector<1x2x256xf32> to vector<2x256xf32>
    %121 = arith.mulf %118, %120 : vector<2x256xf32>
    %122 = arith.addf %117, %121 : vector<2x256xf32>
    %c14_i32 = arith.constant 14 : i32
    %123 = tpu.dynamic_rotate %30 by %c14_i32 dim 1 : vector<2x256xf32>, i32 -> vector<2x256xf32>
    %c19 = arith.constant 19 : index
    %c0_55 = arith.constant 0 : index
    %c0_56 = arith.constant 0 : index
    %124 = vector.load %arg4[%c19, %c0_55, %c0_56] : memref<49x2x256xf32, #tpu.memory_space<vmem>>, vector<1x2x256xf32>
    %125 = vector.shape_cast %124 : vector<1x2x256xf32> to vector<2x256xf32>
    %126 = arith.mulf %123, %125 : vector<2x256xf32>
    %127 = arith.addf %122, %126 : vector<2x256xf32>
    %c13_i32 = arith.constant 13 : i32
    %128 = tpu.dynamic_rotate %30 by %c13_i32 dim 1 : vector<2x256xf32>, i32 -> vector<2x256xf32>
    %c20 = arith.constant 20 : index
    %c0_57 = arith.constant 0 : index
    %c0_58 = arith.constant 0 : index
    %129 = vector.load %arg4[%c20, %c0_57, %c0_58] : memref<49x2x256xf32, #tpu.memory_space<vmem>>, vector<1x2x256xf32>
    %130 = vector.shape_cast %129 : vector<1x2x256xf32> to vector<2x256xf32>
    %131 = arith.mulf %128, %130 : vector<2x256xf32>
    %132 = arith.addf %127, %131 : vector<2x256xf32>
    %c3_i32 = arith.constant 3 : i32
    %133 = tpu.dynamic_rotate %30 by %c3_i32 dim 1 : vector<2x256xf32>, i32 -> vector<2x256xf32>
    %c21 = arith.constant 21 : index
    %c0_59 = arith.constant 0 : index
    %c0_60 = arith.constant 0 : index
    %134 = vector.load %arg4[%c21, %c0_59, %c0_60] : memref<49x2x256xf32, #tpu.memory_space<vmem>>, vector<1x2x256xf32>
    %135 = vector.shape_cast %134 : vector<1x2x256xf32> to vector<2x256xf32>
    %136 = arith.mulf %133, %135 : vector<2x256xf32>
    %c2_i32 = arith.constant 2 : i32
    %137 = tpu.dynamic_rotate %30 by %c2_i32 dim 1 : vector<2x256xf32>, i32 -> vector<2x256xf32>
    %c22 = arith.constant 22 : index
    %c0_61 = arith.constant 0 : index
    %c0_62 = arith.constant 0 : index
    %138 = vector.load %arg4[%c22, %c0_61, %c0_62] : memref<49x2x256xf32, #tpu.memory_space<vmem>>, vector<1x2x256xf32>
    %139 = vector.shape_cast %138 : vector<1x2x256xf32> to vector<2x256xf32>
    %140 = arith.mulf %137, %139 : vector<2x256xf32>
    %141 = arith.addf %136, %140 : vector<2x256xf32>
    %c1_i32 = arith.constant 1 : i32
    %142 = tpu.dynamic_rotate %30 by %c1_i32 dim 1 : vector<2x256xf32>, i32 -> vector<2x256xf32>
    %c23 = arith.constant 23 : index
    %c0_63 = arith.constant 0 : index
    %c0_64 = arith.constant 0 : index
    %143 = vector.load %arg4[%c23, %c0_63, %c0_64] : memref<49x2x256xf32, #tpu.memory_space<vmem>>, vector<1x2x256xf32>
    %144 = vector.shape_cast %143 : vector<1x2x256xf32> to vector<2x256xf32>
    %145 = arith.mulf %142, %144 : vector<2x256xf32>
    %146 = arith.addf %141, %145 : vector<2x256xf32>
    %c24 = arith.constant 24 : index
    %c0_65 = arith.constant 0 : index
    %c0_66 = arith.constant 0 : index
    %147 = vector.load %arg4[%c24, %c0_65, %c0_66] : memref<49x2x256xf32, #tpu.memory_space<vmem>>, vector<1x2x256xf32>
    %148 = vector.shape_cast %147 : vector<1x2x256xf32> to vector<2x256xf32>
    %149 = arith.mulf %30, %148 : vector<2x256xf32>
    %150 = arith.addf %146, %149 : vector<2x256xf32>
    %c255_i32 = arith.constant 255 : i32
    %151 = tpu.dynamic_rotate %30 by %c255_i32 dim 1 : vector<2x256xf32>, i32 -> vector<2x256xf32>
    %c25 = arith.constant 25 : index
    %c0_67 = arith.constant 0 : index
    %c0_68 = arith.constant 0 : index
    %152 = vector.load %arg4[%c25, %c0_67, %c0_68] : memref<49x2x256xf32, #tpu.memory_space<vmem>>, vector<1x2x256xf32>
    %153 = vector.shape_cast %152 : vector<1x2x256xf32> to vector<2x256xf32>
    %154 = arith.mulf %151, %153 : vector<2x256xf32>
    %155 = arith.addf %150, %154 : vector<2x256xf32>
    %c254_i32 = arith.constant 254 : i32
    %156 = tpu.dynamic_rotate %30 by %c254_i32 dim 1 : vector<2x256xf32>, i32 -> vector<2x256xf32>
    %c26 = arith.constant 26 : index
    %c0_69 = arith.constant 0 : index
    %c0_70 = arith.constant 0 : index
    %157 = vector.load %arg4[%c26, %c0_69, %c0_70] : memref<49x2x256xf32, #tpu.memory_space<vmem>>, vector<1x2x256xf32>
    %158 = vector.shape_cast %157 : vector<1x2x256xf32> to vector<2x256xf32>
    %159 = arith.mulf %156, %158 : vector<2x256xf32>
    %160 = arith.addf %155, %159 : vector<2x256xf32>
    %c253_i32 = arith.constant 253 : i32
    %161 = tpu.dynamic_rotate %30 by %c253_i32 dim 1 : vector<2x256xf32>, i32 -> vector<2x256xf32>
    %c27 = arith.constant 27 : index
    %c0_71 = arith.constant 0 : index
    %c0_72 = arith.constant 0 : index
    %162 = vector.load %arg4[%c27, %c0_71, %c0_72] : memref<49x2x256xf32, #tpu.memory_space<vmem>>, vector<1x2x256xf32>
    %163 = vector.shape_cast %162 : vector<1x2x256xf32> to vector<2x256xf32>
    %164 = arith.mulf %161, %163 : vector<2x256xf32>
    %165 = arith.addf %160, %164 : vector<2x256xf32>
    %c243_i32 = arith.constant 243 : i32
    %166 = tpu.dynamic_rotate %30 by %c243_i32 dim 1 : vector<2x256xf32>, i32 -> vector<2x256xf32>
    %c28 = arith.constant 28 : index
    %c0_73 = arith.constant 0 : index
    %c0_74 = arith.constant 0 : index
    %167 = vector.load %arg4[%c28, %c0_73, %c0_74] : memref<49x2x256xf32, #tpu.memory_space<vmem>>, vector<1x2x256xf32>
    %168 = vector.shape_cast %167 : vector<1x2x256xf32> to vector<2x256xf32>
    %169 = arith.mulf %166, %168 : vector<2x256xf32>
    %c242_i32 = arith.constant 242 : i32
    %170 = tpu.dynamic_rotate %30 by %c242_i32 dim 1 : vector<2x256xf32>, i32 -> vector<2x256xf32>
    %c29 = arith.constant 29 : index
    %c0_75 = arith.constant 0 : index
    %c0_76 = arith.constant 0 : index
    %171 = vector.load %arg4[%c29, %c0_75, %c0_76] : memref<49x2x256xf32, #tpu.memory_space<vmem>>, vector<1x2x256xf32>
    %172 = vector.shape_cast %171 : vector<1x2x256xf32> to vector<2x256xf32>
    %173 = arith.mulf %170, %172 : vector<2x256xf32>
    %174 = arith.addf %169, %173 : vector<2x256xf32>
    %c241_i32 = arith.constant 241 : i32
    %175 = tpu.dynamic_rotate %30 by %c241_i32 dim 1 : vector<2x256xf32>, i32 -> vector<2x256xf32>
    %c30 = arith.constant 30 : index
    %c0_77 = arith.constant 0 : index
    %c0_78 = arith.constant 0 : index
    %176 = vector.load %arg4[%c30, %c0_77, %c0_78] : memref<49x2x256xf32, #tpu.memory_space<vmem>>, vector<1x2x256xf32>
    %177 = vector.shape_cast %176 : vector<1x2x256xf32> to vector<2x256xf32>
    %178 = arith.mulf %175, %177 : vector<2x256xf32>
    %179 = arith.addf %174, %178 : vector<2x256xf32>
    %c240_i32 = arith.constant 240 : i32
    %180 = tpu.dynamic_rotate %30 by %c240_i32 dim 1 : vector<2x256xf32>, i32 -> vector<2x256xf32>
    %c31 = arith.constant 31 : index
    %c0_79 = arith.constant 0 : index
    %c0_80 = arith.constant 0 : index
    %181 = vector.load %arg4[%c31, %c0_79, %c0_80] : memref<49x2x256xf32, #tpu.memory_space<vmem>>, vector<1x2x256xf32>
    %182 = vector.shape_cast %181 : vector<1x2x256xf32> to vector<2x256xf32>
    %183 = arith.mulf %180, %182 : vector<2x256xf32>
    %184 = arith.addf %179, %183 : vector<2x256xf32>
    %c239_i32 = arith.constant 239 : i32
    %185 = tpu.dynamic_rotate %30 by %c239_i32 dim 1 : vector<2x256xf32>, i32 -> vector<2x256xf32>
    %c32 = arith.constant 32 : index
    %c0_81 = arith.constant 0 : index
    %c0_82 = arith.constant 0 : index
    %186 = vector.load %arg4[%c32, %c0_81, %c0_82] : memref<49x2x256xf32, #tpu.memory_space<vmem>>, vector<1x2x256xf32>
    %187 = vector.shape_cast %186 : vector<1x2x256xf32> to vector<2x256xf32>
    %188 = arith.mulf %185, %187 : vector<2x256xf32>
    %189 = arith.addf %184, %188 : vector<2x256xf32>
    %c238_i32 = arith.constant 238 : i32
    %190 = tpu.dynamic_rotate %30 by %c238_i32 dim 1 : vector<2x256xf32>, i32 -> vector<2x256xf32>
    %c33 = arith.constant 33 : index
    %c0_83 = arith.constant 0 : index
    %c0_84 = arith.constant 0 : index
    %191 = vector.load %arg4[%c33, %c0_83, %c0_84] : memref<49x2x256xf32, #tpu.memory_space<vmem>>, vector<1x2x256xf32>
    %192 = vector.shape_cast %191 : vector<1x2x256xf32> to vector<2x256xf32>
    %193 = arith.mulf %190, %192 : vector<2x256xf32>
    %194 = arith.addf %189, %193 : vector<2x256xf32>
    %c237_i32 = arith.constant 237 : i32
    %195 = tpu.dynamic_rotate %30 by %c237_i32 dim 1 : vector<2x256xf32>, i32 -> vector<2x256xf32>
    %c34 = arith.constant 34 : index
    %c0_85 = arith.constant 0 : index
    %c0_86 = arith.constant 0 : index
    %196 = vector.load %arg4[%c34, %c0_85, %c0_86] : memref<49x2x256xf32, #tpu.memory_space<vmem>>, vector<1x2x256xf32>
    %197 = vector.shape_cast %196 : vector<1x2x256xf32> to vector<2x256xf32>
    %198 = arith.mulf %195, %197 : vector<2x256xf32>
    %199 = arith.addf %194, %198 : vector<2x256xf32>
    %c227_i32 = arith.constant 227 : i32
    %200 = tpu.dynamic_rotate %30 by %c227_i32 dim 1 : vector<2x256xf32>, i32 -> vector<2x256xf32>
    %c35 = arith.constant 35 : index
    %c0_87 = arith.constant 0 : index
    %c0_88 = arith.constant 0 : index
    %201 = vector.load %arg4[%c35, %c0_87, %c0_88] : memref<49x2x256xf32, #tpu.memory_space<vmem>>, vector<1x2x256xf32>
    %202 = vector.shape_cast %201 : vector<1x2x256xf32> to vector<2x256xf32>
    %203 = arith.mulf %200, %202 : vector<2x256xf32>
    %c226_i32 = arith.constant 226 : i32
    %204 = tpu.dynamic_rotate %30 by %c226_i32 dim 1 : vector<2x256xf32>, i32 -> vector<2x256xf32>
    %c36 = arith.constant 36 : index
    %c0_89 = arith.constant 0 : index
    %c0_90 = arith.constant 0 : index
    %205 = vector.load %arg4[%c36, %c0_89, %c0_90] : memref<49x2x256xf32, #tpu.memory_space<vmem>>, vector<1x2x256xf32>
    %206 = vector.shape_cast %205 : vector<1x2x256xf32> to vector<2x256xf32>
    %207 = arith.mulf %204, %206 : vector<2x256xf32>
    %208 = arith.addf %203, %207 : vector<2x256xf32>
    %c225_i32 = arith.constant 225 : i32
    %209 = tpu.dynamic_rotate %30 by %c225_i32 dim 1 : vector<2x256xf32>, i32 -> vector<2x256xf32>
    %c37 = arith.constant 37 : index
    %c0_91 = arith.constant 0 : index
    %c0_92 = arith.constant 0 : index
    %210 = vector.load %arg4[%c37, %c0_91, %c0_92] : memref<49x2x256xf32, #tpu.memory_space<vmem>>, vector<1x2x256xf32>
    %211 = vector.shape_cast %210 : vector<1x2x256xf32> to vector<2x256xf32>
    %212 = arith.mulf %209, %211 : vector<2x256xf32>
    %213 = arith.addf %208, %212 : vector<2x256xf32>
    %c224_i32 = arith.constant 224 : i32
    %214 = tpu.dynamic_rotate %30 by %c224_i32 dim 1 : vector<2x256xf32>, i32 -> vector<2x256xf32>
    %c38 = arith.constant 38 : index
    %c0_93 = arith.constant 0 : index
    %c0_94 = arith.constant 0 : index
    %215 = vector.load %arg4[%c38, %c0_93, %c0_94] : memref<49x2x256xf32, #tpu.memory_space<vmem>>, vector<1x2x256xf32>
    %216 = vector.shape_cast %215 : vector<1x2x256xf32> to vector<2x256xf32>
    %217 = arith.mulf %214, %216 : vector<2x256xf32>
    %218 = arith.addf %213, %217 : vector<2x256xf32>
    %c223_i32 = arith.constant 223 : i32
    %219 = tpu.dynamic_rotate %30 by %c223_i32 dim 1 : vector<2x256xf32>, i32 -> vector<2x256xf32>
    %c39 = arith.constant 39 : index
    %c0_95 = arith.constant 0 : index
    %c0_96 = arith.constant 0 : index
    %220 = vector.load %arg4[%c39, %c0_95, %c0_96] : memref<49x2x256xf32, #tpu.memory_space<vmem>>, vector<1x2x256xf32>
    %221 = vector.shape_cast %220 : vector<1x2x256xf32> to vector<2x256xf32>
    %222 = arith.mulf %219, %221 : vector<2x256xf32>
    %223 = arith.addf %218, %222 : vector<2x256xf32>
    %c222_i32 = arith.constant 222 : i32
    %224 = tpu.dynamic_rotate %30 by %c222_i32 dim 1 : vector<2x256xf32>, i32 -> vector<2x256xf32>
    %c40 = arith.constant 40 : index
    %c0_97 = arith.constant 0 : index
    %c0_98 = arith.constant 0 : index
    %225 = vector.load %arg4[%c40, %c0_97, %c0_98] : memref<49x2x256xf32, #tpu.memory_space<vmem>>, vector<1x2x256xf32>
    %226 = vector.shape_cast %225 : vector<1x2x256xf32> to vector<2x256xf32>
    %227 = arith.mulf %224, %226 : vector<2x256xf32>
    %228 = arith.addf %223, %227 : vector<2x256xf32>
    %c221_i32 = arith.constant 221 : i32
    %229 = tpu.dynamic_rotate %30 by %c221_i32 dim 1 : vector<2x256xf32>, i32 -> vector<2x256xf32>
    %c41 = arith.constant 41 : index
    %c0_99 = arith.constant 0 : index
    %c0_100 = arith.constant 0 : index
    %230 = vector.load %arg4[%c41, %c0_99, %c0_100] : memref<49x2x256xf32, #tpu.memory_space<vmem>>, vector<1x2x256xf32>
    %231 = vector.shape_cast %230 : vector<1x2x256xf32> to vector<2x256xf32>
    %232 = arith.mulf %229, %231 : vector<2x256xf32>
    %233 = arith.addf %228, %232 : vector<2x256xf32>
    %c211_i32 = arith.constant 211 : i32
    %234 = tpu.dynamic_rotate %30 by %c211_i32 dim 1 : vector<2x256xf32>, i32 -> vector<2x256xf32>
    %c42 = arith.constant 42 : index
    %c0_101 = arith.constant 0 : index
    %c0_102 = arith.constant 0 : index
    %235 = vector.load %arg4[%c42, %c0_101, %c0_102] : memref<49x2x256xf32, #tpu.memory_space<vmem>>, vector<1x2x256xf32>
    %236 = vector.shape_cast %235 : vector<1x2x256xf32> to vector<2x256xf32>
    %237 = arith.mulf %234, %236 : vector<2x256xf32>
    %c210_i32 = arith.constant 210 : i32
    %238 = tpu.dynamic_rotate %30 by %c210_i32 dim 1 : vector<2x256xf32>, i32 -> vector<2x256xf32>
    %c43 = arith.constant 43 : index
    %c0_103 = arith.constant 0 : index
    %c0_104 = arith.constant 0 : index
    %239 = vector.load %arg4[%c43, %c0_103, %c0_104] : memref<49x2x256xf32, #tpu.memory_space<vmem>>, vector<1x2x256xf32>
    %240 = vector.shape_cast %239 : vector<1x2x256xf32> to vector<2x256xf32>
    %241 = arith.mulf %238, %240 : vector<2x256xf32>
    %242 = arith.addf %237, %241 : vector<2x256xf32>
    %c209_i32 = arith.constant 209 : i32
    %243 = tpu.dynamic_rotate %30 by %c209_i32 dim 1 : vector<2x256xf32>, i32 -> vector<2x256xf32>
    %c44 = arith.constant 44 : index
    %c0_105 = arith.constant 0 : index
    %c0_106 = arith.constant 0 : index
    %244 = vector.load %arg4[%c44, %c0_105, %c0_106] : memref<49x2x256xf32, #tpu.memory_space<vmem>>, vector<1x2x256xf32>
    %245 = vector.shape_cast %244 : vector<1x2x256xf32> to vector<2x256xf32>
    %246 = arith.mulf %243, %245 : vector<2x256xf32>
    %247 = arith.addf %242, %246 : vector<2x256xf32>
    %c208_i32 = arith.constant 208 : i32
    %248 = tpu.dynamic_rotate %30 by %c208_i32 dim 1 : vector<2x256xf32>, i32 -> vector<2x256xf32>
    %c45 = arith.constant 45 : index
    %c0_107 = arith.constant 0 : index
    %c0_108 = arith.constant 0 : index
    %249 = vector.load %arg4[%c45, %c0_107, %c0_108] : memref<49x2x256xf32, #tpu.memory_space<vmem>>, vector<1x2x256xf32>
    %250 = vector.shape_cast %249 : vector<1x2x256xf32> to vector<2x256xf32>
    %251 = arith.mulf %248, %250 : vector<2x256xf32>
    %252 = arith.addf %247, %251 : vector<2x256xf32>
    %c207_i32 = arith.constant 207 : i32
    %253 = tpu.dynamic_rotate %30 by %c207_i32 dim 1 : vector<2x256xf32>, i32 -> vector<2x256xf32>
    %c46 = arith.constant 46 : index
    %c0_109 = arith.constant 0 : index
    %c0_110 = arith.constant 0 : index
    %254 = vector.load %arg4[%c46, %c0_109, %c0_110] : memref<49x2x256xf32, #tpu.memory_space<vmem>>, vector<1x2x256xf32>
    %255 = vector.shape_cast %254 : vector<1x2x256xf32> to vector<2x256xf32>
    %256 = arith.mulf %253, %255 : vector<2x256xf32>
    %257 = arith.addf %252, %256 : vector<2x256xf32>
    %c206_i32 = arith.constant 206 : i32
    %258 = tpu.dynamic_rotate %30 by %c206_i32 dim 1 : vector<2x256xf32>, i32 -> vector<2x256xf32>
    %c47 = arith.constant 47 : index
    %c0_111 = arith.constant 0 : index
    %c0_112 = arith.constant 0 : index
    %259 = vector.load %arg4[%c47, %c0_111, %c0_112] : memref<49x2x256xf32, #tpu.memory_space<vmem>>, vector<1x2x256xf32>
    %260 = vector.shape_cast %259 : vector<1x2x256xf32> to vector<2x256xf32>
    %261 = arith.mulf %258, %260 : vector<2x256xf32>
    %262 = arith.addf %257, %261 : vector<2x256xf32>
    %c205_i32 = arith.constant 205 : i32
    %263 = tpu.dynamic_rotate %30 by %c205_i32 dim 1 : vector<2x256xf32>, i32 -> vector<2x256xf32>
    %c48 = arith.constant 48 : index
    %c0_113 = arith.constant 0 : index
    %c0_114 = arith.constant 0 : index
    %264 = vector.load %arg4[%c48, %c0_113, %c0_114] : memref<49x2x256xf32, #tpu.memory_space<vmem>>, vector<1x2x256xf32>
    %265 = vector.shape_cast %264 : vector<1x2x256xf32> to vector<2x256xf32>
    %266 = arith.mulf %263, %265 : vector<2x256xf32>
    %267 = arith.addf %262, %266 : vector<2x256xf32>
    %268 = arith.addf %64, %98 : vector<2x256xf32>
    %269 = arith.addf %132, %165 : vector<2x256xf32>
    %270 = arith.addf %199, %233 : vector<2x256xf32>
    %271 = arith.addf %268, %269 : vector<2x256xf32>
    %272 = arith.addf %270, %267 : vector<2x256xf32>
    %273 = arith.addf %271, %272 : vector<2x256xf32>
    %cst_115 = arith.constant dense<0.000000e+00> : vector<256xf32>
    %274 = vector.multi_reduction <add>, %273, %cst_115 [0] : vector<2x256xf32> to vector<256xf32>
    %275 = vector.shape_cast %274 : vector<256xf32> to vector<1x256xf32>
    %276 = arith.negf %275 : vector<1x256xf32>
    %277 = math.exp %276 : vector<1x256xf32>
    %cst_116 = arith.constant 1.000000e+00 : f32
    %278 = vector.broadcast %cst_116 : f32 to vector<1x256xf32>
    %279 = arith.addf %278, %277 : vector<1x256xf32>
    %280 = arith.divf %278, %279 : vector<1x256xf32>
    %281 = vector.broadcast %280 : vector<1x256xf32> to vector<32x256xf32>
    %282 = arith.mulf %23, %281 : vector<32x256xf32>
    %c0_117 = arith.constant 0 : index
    %c0_118 = arith.constant 0 : index
    %c0_119 = arith.constant 0 : index
    %283 = vector.load %arg6[%c0_117, %c0_118, %c0_119] : memref<1x32x256xf32, #tpu.memory_space<vmem>>, vector<1x32x256xf32>
    %284 = vector.shape_cast %283 : vector<1x32x256xf32> to vector<32x256xf32>
    %285 = vector.shape_cast %282 : vector<32x256xf32> to vector<1x32x256xf32>
    tpu.vector_store %arg6[%c0_117, %c0_118, %c0_119], %285 {strides = array<i32>} : memref<1x32x256xf32, #tpu.memory_space<vmem>>, vector<1x32x256xf32>,
    return
  }
  func.func @transform_0(%arg0: i32) -> (i32, i32, i32) {
    %c0_i32 = arith.constant 0 : i32
    %c0_i32_0 = arith.constant 0 : i32
    %c0_i32_1 = arith.constant 0 : i32
    return %arg0, %c0_i32, %c0_i32_0 : i32, i32, i32
  }
  func.func @transform_1(%arg0: i32) -> (i32, i32) {
    %c0_i32 = arith.constant 0 : i32
    %c0_i32_0 = arith.constant 0 : i32
    %c0_i32_1 = arith.constant 0 : i32
    return %c0_i32, %c0_i32_0 : i32, i32
  }
  func.func @transform_2(%arg0: i32) -> (i32, i32) {
    %c0_i32 = arith.constant 0 : i32
    %c0_i32_0 = arith.constant 0 : i32
    %c0_i32_1 = arith.constant 0 : i32
    return %c0_i32, %c0_i32_0 : i32, i32
  }
  func.func @transform_3(%arg0: i32) -> (i32, i32, i32) {
    %c0_i32 = arith.constant 0 : i32
    %c0_i32_0 = arith.constant 0 : i32
    %c0_i32_1 = arith.constant 0 : i32
    %c0_i32_2 = arith.constant 0 : i32
    return %c0_i32, %c0_i32_0, %c0_i32_1 : i32, i32, i32
  }
  func.func @transform_4(%arg0: i32) -> (i32, i32) {
    %c0_i32 = arith.constant 0 : i32
    %c0_i32_0 = arith.constant 0 : i32
    %c0_i32_1 = arith.constant 0 : i32
    return %c0_i32, %c0_i32_0 : i32, i32
  }
  func.func @transform_5(%arg0: i32) -> (i32, i32, i32) {
    %c0_i32 = arith.constant 0 : i32
    %c0_i32_0 = arith.constant 0 : i32
    %c0_i32_1 = arith.constant 0 : i32
    return %arg0, %c0_i32, %c0_i32_0 : i32, i32, i32
  }
}

</mosaic_0001>

<bundles_post_ra>
// kernel: tpu_custom_call.1
= control target key start
LH: loop header
LB: loop body
LE: loop exit
PB: predicated region body
PF: predicated region fallthrough
CT: control target
= control target key end

     0   :  { %10 = vsyncpa [#allocation3], 0  ;;  %s3295_s0 = inlined_call_operand.hbm [shape: f32[2,32,256], index: 0, kind: input, shape index: {}]   ;;  %s3296_s1 = inlined_call_operand.vmem [shape: f32[2,32], index: 1, kind: input, shape index: {}]   ;;  %s3297_s2 = inlined_call_operand.vmem [shape: f32[32,2], index: 2, kind: input, shape index: {}]   ;;  %s3298_s3 = inlined_call_operand.hbm [shape: f32[49,2,256], index: 3, kind: input, shape index: {}]   ;;  %s3299_s4 = inlined_call_operand.vmem [shape: f32[1,256], index: 4, kind: input, shape index: {}]   ;;  %s3300_s5 = inlined_call_operand.hbm [shape: f32[2,32,256], index: 5, kind: output, shape index: {}]  }
   0x1   :  { %12 = vsyncpa [#allocation3 + $0x1], 0 }
   0x2   :  { %13 = vsyncpa [#allocation6], 0 }
   0x3   :  { %14 = vsyncpa [#allocation4], 0 }
   0x4   :  { %16 = vsyncpa [#allocation4 + $0x1], 0  ;;  %s2359_s18 = smov 0   ;;  %s2361_s19 = smov 0  }
   0x5   :  { %s2363_s20 = smov 0   ;;  %s2365_s21 = smov 0  }
   0x6 LB: > { %s2380_s4 = sadd.s32 4294967295, %s2267_s21   ;;  %s1885_s22 = sadd.s32 4294967294, %s2267_s21   ;;  %s2267_s21 = sphi %s2365_s21, %s3370_s21   ;;  %s2263_s20 = sphi %s2363_s20, %s3369_s20   ;;  %s2259_s19 = sphi %s2361_s19, %s3368_s19   ;;  %s2255_s18 = sphi %s2359_s18, %s3367_s18  }
   0x7   : > { %p42_p0 = scmp.ne.s32.totalorder %s2259_s19, %s2255_s18  ;;  %p3301_p1 = scmp.eq.s32.totalorder %s2380_s4, 0 }
   0x8   : > { %p156_p3 = scmp.eq.s32.totalorder %s1885_s22, 1  ;;  %p1886_p5 = scmp.ge.s32.totalorder %s2267_s21, 1 }
   0x9   : > { %p2389_p4 = por %p3301_p1, %p42_p0  ;;  %p163_p7 = scmp.lt.s32.totalorder %s2267_s21, 3 }
   0xa   : > { %p2394_p6 = por %p156_p3, %p42_p0  ;;  %s2269_s26 = smov [#allocation5]  }
   0xb   : > { %s3317_s23 = scalar_select %p2389_p4, 1, 0 }
   0xc   : > { %s3318_s24 = scalar_select %p2394_p6, 1, 0 }
   0xd   : > { %p2399_p8 = pnand %p1886_p5, %p163_p7  ;;  %s181_s27 = sshll.u32 %s2269_s26, 4  ;;  %s2403_s27 = int_to_ptr.vmem [resolvable:$true] %s181_s27 }
   0xe   : > { %s2415_s29 = sadd.s32 1, %s2267_s21   ;;  %s29_s30 = sadd.s32 1, %s2263_s20 }
   0xf   : > { %s3319_s25 = scalar_select %p2399_p8, 1, 0 }
  0x10   : > { %p2007_p9 = pneg %p2399_p8  ;;  %s26_s6 = ssub.s32 %s2267_s21, %s2415_s29 }
  0x11   : > { %s2139_s9 = scalar_lea.hbm %s3298_s3, 3136 }
  0x12   : > { %p2410_p11 = pnand %p2007_p9, %p3301_p1  ;;  %p2140_p12 = scmp.ne.s32.totalorder %s3298_s3, %s2139_s9 }
  0x13   : > { %p2146_p5 = scmp.lt.u32.totalorder %s2139_s9, %s3298_s3 }
  0x14   : > { %p2141_p13 = pneg %p2410_p11 }
  0x16   : > { %p2142_p0 = pnand %p2141_p13, %p2140_p12 }
  0x18   : > { %p2143_p3 = pneg %p2142_p0 }
  0x1a   : > { %p2148_p7 = pnand %p2146_p5, %p2143_p3 }
  0x1c   : > { %2151 = shalt.err (!%p2148_p7)
}
  0x1d   : > { %s2152_s14 = scalar_lea.vmem %s2403_s27, 3136  ;;  %p2160_p2 = scmp.lt.s32.totalorder %s2403_s27, %s2403_s27 }
  0x1e   : > { %p2153_p9 = scmp.ne.s32.totalorder %s2403_s27, %s2152_s14  ;;  %p2161_p6 = scmp.lt.s32.totalorder %s2152_s14, %s2152_s14 }
  0x20   : > { %p2155_p10 = pnand %p2153_p9, %p2141_p13  ;;  %p2162_p4 = por %p2161_p6, %p2160_p2 }
  0x22   : > { %p2156_p1 = pneg %p2155_p10 }
  0x24   : > { %p2163_p8 = pnand %p2162_p4, %p2156_p1 }
  0x26   : > { %2166 = shalt.err (!%p2163_p8)
}
  0x27   : > { %s2270_s15 = smov 64   ;;  %s2271_s16 = smov 4  }
  0x28   : > { %2010 = dma.hbm_to_vmem [thread:$0]  (!%p2410_p11), %s3298_s3, 3136, %s2403_s27, [#allocation6], %s2270_s15, %s2270_s15, %s2271_s16  }
  0x29   : > { %p27_p2 = scmp.eq.s32.totalorder %s26_s6, 0  ;;  %p36_p1 = scmp.ne.s32.totalorder %s2263_s20, %s2259_s19 }
  0x2a   : > { %p37_p4 = scmp.eq.s32.totalorder %s2267_s21, 0  ;;  %p2020_p6 = scmp.lt.s32.totalorder %s2267_s21, 2 }
  0x2b   : > { %s2446_s26 = scalar_select %p27_p2, %s2263_s20, %s29_s30  }
  0x2c   : > { %p38_p8 = por %p37_p4, %p36_p1  ;;  %p3321_p10 = scmp.eq.s32.totalorder %s2380_s4, 1 }
  0x2d   : > { %s198_s8 = sand.u32 1, %s2263_s20   ;;  %s1962_s9 = sshll.u32 %s2267_s21, 10 }
  0x2e   : > { %p2450_p12 = por %p3321_p10, %p36_p1  ;;  %s1889_s10 = sshll.u32 %s198_s8, 6 }
  0x2f   : > { %s2459_s12 = scalar_lea.hbm %s3295_s0, %s1962_s9  ;;  %s202_s27 = scalar_lea.vmem [#allocation2], %s1889_s10 }
  0x30   : > { %s209_s30 = sshll.u32 %s202_s27, 4  ;;  %p2461_p11 = pnand %p2020_p6, %p38_p8  ;;  %s2465_s30 = int_to_ptr.vmem [resolvable:$true] %s209_s30 }
  0x31   : > { %s2467_s13 = scalar_lea.sflag [#allocation3], %s198_s8  ;;  %s2167_s14 = scalar_lea.hbm %s2459_s12, 1024 }
  0x32   : > { %p2168_p13 = scmp.ne.s32.totalorder %s2459_s12, %s2167_s14  ;;  %p2169_p0 = pneg %p2461_p11 }
  0x33   : > { %s2172_s17 = scalar_lea.hbm %s3295_s0, 2048  ;;  %p2173_p7 = scmp.lt.u32.totalorder %s2459_s12, %s3295_s0 }
  0x34   : > { %p2170_p3 = pnand %p2169_p0, %p2168_p13  ;;  %p2174_p9 = scmp.lt.u32.totalorder %s2172_s17, %s2167_s14 }
  0x35   : > { %p2176_p1 = scmp.lt.u32.totalorder %s2167_s14, %s2459_s12 }
  0x36   : > { %p2171_p5 = pneg %p2170_p3  ;;  %p2175_p2 = por %p2174_p9, %p2173_p7 }
  0x38   : > { %p2177_p4 = por %p2176_p1, %p2175_p2 }
  0x3a   : > { %p2178_p6 = pnand %p2177_p4, %p2171_p5 }
  0x3c   : > { %2181 = shalt.err (!%p2178_p6)
}
  0x3d   : > { %s2182_s8 = scalar_lea.vmem %s2465_s30, 1024  ;;  %s2272_s10 = smov [#allocation2]  }
  0x3e   : > { %p2183_p8 = scmp.ne.s32.totalorder %s2465_s30, %s2182_s8  ;;  %s2187_s28 = sshll.u32 %s2272_s10, 4  ;;  %s2188_s28 = int_to_ptr.vmem [resolvable:$false] %s2187_s28 }
  0x3f   : > { %s2189_s11 = scalar_lea.vmem %s2188_s28, 2048  ;;  %p2190_p3 = scmp.lt.s32.totalorder %s2465_s30, %s2188_s28 }
  0x40   : > { %p2185_p10 = pnand %p2183_p8, %p2169_p0  ;;  %p2191_p7 = scmp.lt.s32.totalorder %s2189_s11, %s2182_s8 }
  0x42   : > { %p2186_p13 = pneg %p2185_p10  ;;  %p2192_p9 = por %p2191_p7, %p2190_p3 }
  0x44   : > { %p2193_p2 = pnand %p2192_p9, %p2186_p13 }
  0x46   : > { %2196 = shalt.err (!%p2193_p2)
}
  0x47   : > { %s2273_s27 = smov 256   ;;  %s2274_s14 = smov 16  }
  0x48   : > { %2014 = dma.hbm_to_vmem [thread:$0]  (!%p2461_p11), %s2459_s12, 1024, %s2465_s30, %s2467_s13, %s2273_s27, %s2273_s27, %s2274_s14  }
  0x49   : > { %p3324_p0 = scmp.ne.s32.totalorder %s3319_s25, 0 }
  0x4b   : > { %221 = sbr.rel (%p3324_p0) target bundleno = 1390 (0x56e), region = 40 }
  0x52   : > { %s2498_s15 = sand.u32 1, %s2259_s19   ;;  %p3325_p5 = scmp.ne.s32.totalorder %s3317_s23, 0 }
  0x53   : > { %s1893_s16 = sshll.u32 %s2498_s15, 6  ;;  %s224_s17 = scalar_lea.sflag [#allocation3], %s2498_s15 }
  0x54   : > { %s227_s22 = scalar_lea.vmem [#allocation2], %s1893_s16 }
  0x55   : > { %2242 = dma.done.wait (%p3325_p5), %s224_s17, 1024  }
  0x56   : > { %2244 = vsyncadd (%p3325_p5), %s224_s17, 4294966272  ;;  %p3326_p11 = scmp.eq.s32.totalorder %s2380_s4, 0 }
  0x58   : > { %2246 = dma.done.wait (%p3326_p11), [#allocation6], 3136   ;;  %p3327_p1 = pmov %p3326_p11 }
  0x59   : > { %v2512_v0 = vld [vmem:[%s227_s22] sm:$0xff]  ;;  %v2514_v1 = vld [vmem:[%s227_s22 + $0x8] sm:$0xff]  ;;  %v2516_v2 = vld [vmem:[%s227_s22 + $0x10] sm:$0xff]  ;;  %v2275_v16 = vmov 0.0|0.0   ;;  %vm2276_vm0 = vmmov 0   ;;  %v2277_v17 = vmov 0.0  }
  0x5a   : > { %2248 = vsyncadd (%p3327_p1), [#allocation6], 4294964160  ;;  %v278_v3 = vadd.f32 %v2514_v1, %v2512_v0  ;;  %v266_v4 = vmax.f32 %v2512_v0, %v2514_v1  ;;  %v2522_v5 = vld [vmem:[%s227_s22 + $0x18] sm:$0xff]  ;;  %v2528_v8 = vld [vmem:[%s227_s22 + $0x20] sm:$0xff]  ;;  %1993 = vmatprep.subr.bf16.mxu0 %v2275_v16  ;;  %1982 = vmatprep.mubr.msk.f32.mxu0 %vm2276_vm0, %v2277_v17  ;;  %vm294_vm1 = vcmask 7168   ;;  %vm300_vm2 = vcmask 261120  }
  0x5b   : > { %v281_v6 = vadd.f32 %v2522_v5, %v2516_v2  ;;  %v269_v7 = vmax.f32 %v2516_v2, %v2522_v5  ;;  %v2530_v9 = vld [vmem:[%s227_s22 + $0x28] sm:$0xff]  ;;  %v2532_v10 = vld [vmem:[%s227_s22 + $0x30] sm:$0xff]  ;;  %v2534_v11 = vld [vmem:[%s227_s22 + $0x38] sm:$0xff]  ;;  %vm375_vm3 = vcmask 9216   ;;  %vm383_vm4 = vcmask 15360   ;;  %s2279_s11 = smov 48  }
  0x5c   : > { %279 = vadd.xlane.f32.xlu0 %v278_v3  ;;  %267 = vmax.xlane.f32.xlu1 %v266_v4  ;;  %v284_v12 = vadd.f32 %v2530_v9, %v2528_v8  ;;  %v287_v13 = vadd.f32 %v2534_v11, %v2532_v10  ;;  %v272_v14 = vmax.f32 %v2528_v8, %v2530_v9  ;;  %v299_v36 = vld [vmem:[%s3296_s1] sm:$0x3]  ;;  %vm396_vm5 = vcmask 1041408   ;;  %v380_v43 = vld [vmem:[%s3297_s2 + $0x8] sm:$0xff]  ;;  %v381_v44 = vld [vmem:[%s3297_s2 + $0x10] sm:$0xff]  ;;  %s2280_s27 = smov 51  }
  0x5d   : > { %v275_v15 = vmax.f32 %v2532_v10, %v2534_v11  ;;  %v379_v41 = vld [vmem:[%s3297_s2] sm:$0xff]  ;;  %v382_v45 = vld [vmem:[%s3297_s2 + $0x18] sm:$0xff]  ;;  %v2278_v46 = vmov 0   ;;  %vm575_vm6 = vcmask 1040384   ;;  %s2281_s14 = smov 47   ;;  %s2282_s17 = smov 46  }
  0x5e   : > { %1987 = vmatprep.mubr.msk.f32.mxu1 %vm383_vm4, %v379_v41  ;;  %2113 = vset.pattern.permute.xlu0 %v2278_v46  ;;  %s2283_s22 = smov 50   ;;  %s2284_s23 = smov 45  }
  0x5f   : > { %2114 = vset.pattern.permute.xlu1 %v2278_v46  ;;  %s2285_s25 = smov 35   ;;  %s2286_s12 = smov 49  }
  0x60   : > { %282 = vadd.xlane.f32.xlu0 %v281_v6  ;;  %270 = vmax.xlane.f32.xlu1 %v269_v7  ;;  %s2287_s30 = smov 34   ;;  %s2288_s6 = smov 33  }
  0x61   : > { %s2289_s13 = smov 32   ;;  %s2290_s9 = smov 31  }
  0x62   : > { %s2291_s8 = smov 30   ;;  %s2292_s10 = smov 29  }
  0x63   : > { %s2293_s28 = smov 19  }
  0x64   : > { %285 = vadd.xlane.f32.xlu0 %v284_v12  ;;  %288 = vadd.xlane.f32.xlu1 %v287_v13 }
  0x68   : > { %273 = vmax.xlane.f32.xlu0 %v272_v14  ;;  %276 = vmax.xlane.f32.xlu1 %v275_v15 }
  0xe9   : > { %v280_v18 = vpop.xlane.xlu0 %279  ;;  %v268_v19 = vpop.xlane.xlu1 %267 }
  0xea   : > { %v290_v20 = vmul.f32 0.00390625, %v280_v18 }
  0xec   : > { %v295_v24 = vsel %vm294_vm1, %v268_v19, %v290_v20 }
  0xed   : > { %v283_v21 = vpop.xlane.xlu0 %282  ;;  %v271_v22 = vpop.xlane.xlu1 %270 }
  0xee   : > { %v291_v23 = vmul.f32 0.00390625, %v283_v21 }
  0xf0   : > { %v296_v25 = vsel %vm294_vm1, %v271_v22, %v291_v23 }
  0xf1   : > { %v286_v26 = vpop.xlane.xlu0 %285  ;;  %v289_v27 = vpop.xlane.xlu1 %288  ;;  %v1994_v28 = vpack.c.bf16 %v296_v25, %v295_v24 }
  0xf2   : > { %v292_v29 = vmul.f32 0.00390625, %v286_v26  ;;  %v293_v30 = vmul.f32 0.00390625, %v289_v27 }
  0xf3   : > { %1995 = vmatpush3.bf16.msra.mxu0 %v1994_v28 }
  0xf4   : > { %1996 = vmatprep.subr.bf16.mxu0 %v2275_v16 }
  0xf5   : > { %v274_v31 = vpop.xlane.xlu0 %273  ;;  %v277_v32 = vpop.xlane.xlu1 %276 }
  0xf6   : > { %v297_v33 = vsel %vm294_vm1, %v274_v31, %v292_v29  ;;  %v298_v34 = vsel %vm294_vm1, %v277_v32, %v293_v30 }
  0xf7   : > { %v1997_v35 = vpack.c.bf16 %v298_v34, %v297_v33 }
  0xf9   : > { %1998 = vmatpush3.bf16.msra.mxu0 %v1997_v35 }
  0xfc   : > { %1983 = vmatmul.mubr.msk.f32.vlgmr.msra.gmra.mrb[0].mxu0 %vm300_vm2, %v299_v36 }
 0x1cf   : > { %v370_v37 = vpop.f32.mrb[0].mxu0 }
 0x1d0   : > { %v374_v38 = vmax.f32 %v370_v37, 0.0  ;;  %v1984_v39 = vpop.f32.mrb[1].mxu0 }
 0x1d2   : > { %v376_v40 = vsel %vm375_vm3, %v374_v38, 0.0 }
 0x1d3   : > { %377 = vadd.xlane.f32.xlu0 %v376_v40 }
 0x260   : > { %v378_v42 = vpop.xlane.xlu0 %377 }
 0x261   : > { %1985 = vmatprep.subr.msk.mxu1 %vm396_vm5, %v378_v42 }
 0x262   : > { %1986 = vmatpush3.msk.msra.mxu1 %vm396_vm5, %v378_v42 }
 0x263   : > { %1988 = vmatmul.mubr.msk.f32.vlgmr.msra.gmra.mrb[0].mxu1 %vm383_vm4, %v380_v43 }
 0x264   : > { %1990 = vmatprep.mubr.msk.f32.mxu1 %vm383_vm4, %v381_v44 }
 0x267   : > { %1991 = vmatmul.mubr.msk.f32.gmra.mrb[2].mxu1 %vm383_vm4, %v382_v45 }
 0x336   : > { %v1989_v47 = vpop.f32.mrb[0].mxu1 }
 0x337   : > { %v1903_v48 = vmul.f32 -1.442695, %v1989_v47  ;;  %v466_v49 = vpop.f32.mrb[1].mxu1 }
 0x338   : > { %v1902_v50 = vmul.f32 -1.442695, %v466_v49 }
 0x339   : > { %2115 = vpow2.f32 %v1903_v48 }
 0x33a   : > { %2117 = vpow2.f32 %v1902_v50  ;;  %v1992_v51 = vpop.f32.mrb[2].mxu1 }
 0x33b   : > { %v1905_v52 = vmul.f32 -1.442695, %v1992_v51  ;;  %v476_v53 = vpop.f32.mrb[3].mxu1 }
 0x33c   : > { %v1904_v54 = vmul.f32 -1.442695, %v476_v53 }
 0x33d   : > { %2119 = vpow2.f32 %v1905_v52 }
 0x33e   : > { %2121 = vpow2.f32 %v1904_v54 }
 0x343   : > { %v2116_v55 = vpop.eup %2115 }
 0x344   : > { %v2118_v56 = vpop.eup %2117  ;;  %v498_v57 = vadd.f32 1.0, %v2116_v55 }
 0x345   : > { %v497_v58 = vadd.f32 1.0, %v2118_v56 }
 0x346   : > { %2123 = vrcp.f32 %v498_v57 }
 0x347   : > { %v2120_v59 = vpop.eup %2119  ;;  %2125 = vrcp.f32 %v497_v58  ;;  %v582_v58 = vlaneseq }
 0x348   : > { %v2122_v60 = vpop.eup %2121  ;;  %v500_v61 = vadd.f32 1.0, %v2120_v59 }
 0x349   : > { %v499_v62 = vadd.f32 1.0, %v2122_v60  ;;  %v2682_v60 = vand.u32 127, %v582_v58  ;;  %v1912_v58 = vld.sshfl [vmem:[#allocation5 + $0x18] sm:$0x33 pattern:$0x76325410] }
 0x34a   : > { %2127 = vrcp.f32 %v500_v61 }
 0x34b   : > { %2129 = vrcp.f32 %v499_v62  ;;  %vm605_vm7 = vcmp.lt.s32.totalorder %v2682_v60, 50  ;;  %vm584_vm8 = vcmp.lt.s32.totalorder %v2682_v60, 51  ;;  %vm629_vm9 = vcmp.lt.s32.totalorder %v2682_v60, 49 }
 0x34c   : > { %vm653_vm10 = vcmp.lt.s32.totalorder %v2682_v60, 48  ;;  %vm677_vm11 = vcmp.lt.s32.totalorder %v2682_v60, 47  ;;  %vm701_vm12 = vcmp.lt.s32.totalorder %v2682_v60, 46  ;;  %vm725_vm13 = vcmp.lt.s32.totalorder %v2682_v60, 45 }
 0x34d   : > { %vm749_vm14 = vcmp.lt.s32.totalorder %v2682_v60, 35  ;;  %vm771_vm15 = vcmp.lt.s32.totalorder %v2682_v60, 34  ;;  %vm795_vm0 = vcmp.lt.s32.totalorder %v2682_v60, 33  ;;  %vm819_vm1 = vcmp.lt.s32.totalorder %v2682_v60, 32 }
 0x34e   : > { %vm843_vm2 = vcmp.lt.s32.totalorder %v2682_v60, 31  ;;  %vm867_vm3 = vcmp.lt.s32.totalorder %v2682_v60, 30  ;;  %vm891_vm4 = vcmp.lt.s32.totalorder %v2682_v60, 29 }
 0x350   : > { %v2124_v63 = vpop.eup %2123 }
 0x351   : > { %v2126_v3 = vpop.eup %2125  ;;  %516 = vperm.xlu0 %2113, %v2124_v63   ;;  %v1907_v63 = vld.sshfl [vmem:[#allocation5 + $0x4] sm:$0x33 pattern:$0x76325410] }
 0x352   : > { %511 = vperm.xlu1 %2114, %v2126_v3  }
 0x354   : > { %v2128_v4 = vpop.eup %2127 }
 0x355   : > { %v2130_v6 = vpop.eup %2129 }
 0x356   : > { %526 = vperm.xlu1 %2114, %v2128_v4  }
 0x35a   : > { %521 = vperm.xlu1 %2114, %v2130_v6   ;;  %v1906_v6 = vld.sshfl [vmem:[#allocation5] sm:$0x33 pattern:$0x76325410] }
 0x3d0   : > { %v517_v12 = vpop.permute.xlu0 %516 }
 0x3d1   : > { %v512_v7 = vpop.permute.xlu1 %511  ;;  %v2566_v14 = vmul.f32 %v517_v12, %v2516_v2  ;;  %v2569_v15 = vmul.f32 %v517_v12, %v2522_v5 }
 0x3d2   : > { %v2572_v16 = vmul.f32 %v512_v7, %v2512_v0  ;;  %v2575_v17 = vmul.f32 %v512_v7, %v2514_v1 }
 0x3d3   : > { %3328 = vst [vmem:[#allocation11_spill] sm:$0xff] %v2566_v14  ;;  %3329 = vst [vmem:[#allocation12_spill] sm:$0xff] %v2569_v15 }
 0x3d4   : > { %3330 = vst [vmem:[#allocation13_spill] sm:$0xff] %v2572_v16  ;;  %3331 = vst [vmem:[#allocation14_spill] sm:$0xff] %v2575_v17  ;;  %v555_v2 = vadd.f32 %v2566_v14, %v2572_v16  ;;  %v564_v5 = vadd.f32 %v2569_v15, %v2575_v17 }
 0x3d5   : > { %v527_v13 = vpop.permute.xlu1 %526 }
 0x3d6   : > { %v2578_v18 = vmul.f32 %v527_v13, %v2532_v10  ;;  %v2581_v19 = vmul.f32 %v527_v13, %v2534_v11  ;;  %v618_v13 = vcombine.high %v1907_v63, %v1907_v63 }
 0x3d8   : > { %3332 = vst [vmem:[#allocation15_spill] sm:$0xff] %v2578_v18  ;;  %3333 = vst [vmem:[#allocation16_spill] sm:$0xff] %v2581_v19  ;;  %v538_v1 = vmax.f32 %v2566_v14, %v2578_v18  ;;  %v547_v10 = vmax.f32 %v2569_v15, %v2581_v19 }
 0x3d9   : > { %v522_v20 = vpop.permute.xlu1 %521 }
 0x3da   : > { %v2588_v21 = vmul.f32 %v522_v20, %v2528_v8  ;;  %v2591_v0 = vmul.f32 %v522_v20, %v2530_v9  ;;  %v1908_v20 = vld.sshfl [vmem:[#allocation5 + $0x8] sm:$0x33 pattern:$0x76325410] }
 0x3dc   : > { %3334 = vst [vmem:[#allocation17_spill] sm:$0xff] %v2588_v21  ;;  %3335 = vst [vmem:[#allocation18_spill] sm:$0xff] %v2591_v0  ;;  %v537_v11 = vmax.f32 %v2572_v16, %v2588_v21  ;;  %v546_v22 = vmax.f32 %v2575_v17, %v2591_v0  ;;  %v556_v23 = vadd.f32 %v555_v2, %v2588_v21 }
 0x3dd   : > { %v565_v8 = vadd.f32 %v564_v5, %v2591_v0  ;;  %v596_v2 = vcombine.high %v1906_v6, %v1906_v6 }
 0x3de   : > { %v539_v24 = vmax.f32 %v537_v11, %v538_v1  ;;  %v548_v25 = vmax.f32 %v546_v22, %v547_v10  ;;  %v557_v9 = vadd.f32 %v556_v23, %v2578_v18  ;;  %v3016_v18 = vld.sshfl [vmem:[#allocation5 + $0xbc] sm:$0x33 pattern:$0x76325410] }
 0x3df   : > { %v566_v26 = vadd.f32 %v565_v8, %v2581_v19  ;;  %v642_v8 = vcombine.high %v1908_v20, %v1908_v20 }
 0x3e0   : > { %v540_v27 = vrot.slane %v539_v24, 4  ;;  %v549_v28 = vrot.slane %v548_v25, 4  ;;  %v558_v29 = vrot.slane %v557_v9, 4 }
 0x3e1   : > { %v567_v30 = vrot.slane %v566_v26, 4 }
 0x3e2   : > { %v541_v31 = vmax.f32 %v539_v24, %v540_v27  ;;  %v550_v32 = vmax.f32 %v548_v25, %v549_v28  ;;  %v559_v33 = vadd.f32 %v558_v29, %v557_v9  ;;  %v1909_v24 = vld.sshfl [vmem:[#allocation5 + $0xc] sm:$0x33 pattern:$0x76325410] }
 0x3e3   : > { %v568_v34 = vadd.f32 %v567_v30, %v566_v26 }
 0x3e4   : > { %v542_v35 = vrot.slane %v541_v31, 2  ;;  %v551_v36 = vrot.slane %v550_v32, 2  ;;  %v560_v37 = vrot.slane %v559_v33, 2 }
 0x3e5   : > { %v569_v38 = vrot.slane %v568_v34, 2 }
 0x3e6   : > { %v543_v39 = vmax.f32 %v541_v31, %v542_v35  ;;  %v561_v40 = vadd.f32 %v560_v37, %v559_v33  ;;  %v552_v43 = vmax.f32 %v550_v32, %v551_v36  ;;  %v666_v31 = vcombine.high %v1909_v24, %v1909_v24  ;;  %v1910_v35 = vld.sshfl [vmem:[#allocation5 + $0x10] sm:$0x33 pattern:$0x76325410] }
 0x3e7   : > { %v570_v41 = vadd.f32 %v569_v38, %v568_v34 }
 0x3e8   : > { %v544_v42 = vrot.slane %v543_v39, 1  ;;  %v562_v44 = vrot.slane %v561_v40, 1  ;;  %v553_v49 = vrot.slane %v552_v43, 1 }
 0x3e9   : > { %v571_v45 = vrot.slane %v570_v41, 1 }
 0x3ea   : > { %v563_v46 = vadd.f32 %v562_v44, %v561_v40  ;;  %v545_v48 = vmax.f32 %v543_v39, %v544_v42  ;;  %v554_v53 = vmax.f32 %v552_v43, %v553_v49  ;;  %v690_v44 = vcombine.high %v1910_v35, %v1910_v35 }
 0x3eb   : > { %v572_v47 = vadd.f32 %v571_v45, %v570_v41  ;;  %v1911_v45 = vld.sshfl [vmem:[#allocation5 + $0x14] sm:$0x33 pattern:$0x76325410] }
 0x3ec   : > { %v573_v50 = vmul.f32 0.03125, %v563_v46 }
 0x3ed   : > { %v574_v51 = vmul.f32 0.03125, %v572_v47 }
 0x3ee   : > { %v2605_v52 = vsel %vm575_vm6, %v545_v48, %v573_v50 }
 0x3ef   : > { %649 = vrot.lane.b32.xlu0 %v2605_v52, %s2279_s11  ;;  %578 = vrot.lane.b32.xlu1 %v2605_v52, %s2280_s27  ;;  %v2609_v54 = vsel %vm575_vm6, %v554_v53, %v574_v51  ;;  %vm915_vm6 = vcmp.lt.s32.totalorder %v2682_v60, 19 }
 0x3f3   : > { %673 = vrot.lane.b32.xlu0 %v2605_v52, %s2281_s14  ;;  %580 = vrot.lane.b32.xlu1 %v2609_v54, %s2280_s27  ;;  %s2295_s27 = smov 17  }
 0x3f7   : > { %697 = vrot.lane.b32.xlu0 %v2605_v52, %s2282_s17  ;;  %601 = vrot.lane.b32.xlu1 %v2605_v52, %s2283_s22 }
 0x3fb   : > { %721 = vrot.lane.b32.xlu0 %v2605_v52, %s2284_s23  ;;  %603 = vrot.lane.b32.xlu1 %v2609_v54, %s2283_s22  ;;  %s2298_s22 = smov 2  }
 0x3ff   : > { %745 = vrot.lane.b32.xlu0 %v2605_v52, %s2285_s25  ;;  %625 = vrot.lane.b32.xlu1 %v2605_v52, %s2286_s12 }
 0x403   : > { %767 = vrot.lane.b32.xlu0 %v2605_v52, %s2287_s30  ;;  %627 = vrot.lane.b32.xlu1 %v2609_v54, %s2286_s12  ;;  %s2301_s12 = smov 99  }
 0x407   : > { %791 = vrot.lane.b32.xlu0 %v2605_v52, %s2288_s6  ;;  %651 = vrot.lane.b32.xlu1 %v2609_v54, %s2279_s11  ;;  %s2294_s11 = smov 18  }
 0x40b   : > { %815 = vrot.lane.b32.xlu0 %v2605_v52, %s2289_s13  ;;  %675 = vrot.lane.b32.xlu1 %v2609_v54, %s2281_s14  ;;  %s2296_s14 = smov 16  }
 0x40f   : > { %839 = vrot.lane.b32.xlu0 %v2605_v52, %s2290_s9  ;;  %699 = vrot.lane.b32.xlu1 %v2609_v54, %s2282_s17  ;;  %s2297_s17 = smov 3  }
 0x413   : > { %863 = vrot.lane.b32.xlu0 %v2605_v52, %s2291_s8  ;;  %723 = vrot.lane.b32.xlu1 %v2609_v54, %s2284_s23  ;;  %s2299_s23 = smov 115  }
 0x417   : > { %887 = vrot.lane.b32.xlu0 %v2605_v52, %s2292_s10  ;;  %747 = vrot.lane.b32.xlu1 %v2609_v54, %s2285_s25  ;;  %s2300_s25 = smov 114  }
 0x41b   : > { %911 = vrot.lane.b32.xlu0 %v2605_v52, %s2293_s28  ;;  %769 = vrot.lane.b32.xlu1 %v2609_v54, %s2287_s30  ;;  %s2302_s30 = smov 98  }
 0x41f   : > { %933 = vrot.lane.b32.xlu0 %v2605_v52, %s2294_s11  ;;  %793 = vrot.lane.b32.xlu1 %v2609_v54, %s2288_s6  ;;  %s2303_s6 = smov 1  }
 0x423   : > { %957 = vrot.lane.b32.xlu0 %v2605_v52, %s2295_s27  ;;  %817 = vrot.lane.b32.xlu1 %v2609_v54, %s2289_s13  ;;  %s2304_s13 = smov 113  }
 0x427   : > { %981 = vrot.lane.b32.xlu0 %v2605_v52, %s2296_s14  ;;  %841 = vrot.lane.b32.xlu1 %v2609_v54, %s2290_s9  ;;  %s2305_s9 = smov 97  }
 0x42b   : > { %1077 = vrot.lane.b32.xlu0 %v2605_v52, %s2297_s17  ;;  %865 = vrot.lane.b32.xlu1 %v2609_v54, %s2291_s8  ;;  %s2306_s8 = smov 83  }
 0x42f   : > { %1099 = vrot.lane.b32.xlu0 %v2605_v52, %s2298_s22  ;;  %889 = vrot.lane.b32.xlu1 %v2609_v54, %s2292_s10  ;;  %s2307_s10 = smov 82  }
 0x433   : > { %1236 = vrot.lane.b32.xlu0 %v2605_v52, %s2299_s23  ;;  %913 = vrot.lane.b32.xlu1 %v2609_v54, %s2293_s28  ;;  %s2308_s28 = smov 112  }
 0x437   : > { %1258 = vrot.lane.b32.xlu0 %v2605_v52, %s2300_s25  ;;  %935 = vrot.lane.b32.xlu1 %v2609_v54, %s2294_s11  ;;  %s2309_s11 = smov 96  }
 0x43b   : > { %1402 = vrot.lane.b32.xlu0 %v2605_v52, %s2301_s12  ;;  %959 = vrot.lane.b32.xlu1 %v2609_v54, %s2295_s27  ;;  %s2310_s27 = smov 81  }
 0x43f   : > { %1424 = vrot.lane.b32.xlu0 %v2605_v52, %s2302_s30  ;;  %983 = vrot.lane.b32.xlu1 %v2609_v54, %s2296_s14 }
 0x443   : > { %1123 = vrot.lane.b32.xlu0 %v2605_v52, %s2303_s6  ;;  %1079 = vrot.lane.b32.xlu1 %v2609_v54, %s2297_s17  ;;  %s2311_s17 = smov 15  }
 0x447   : > { %1282 = vrot.lane.b32.xlu0 %v2605_v52, %s2304_s13  ;;  %1101 = vrot.lane.b32.xlu1 %v2609_v54, %s2298_s22  ;;  %s2312_s22 = smov 127  }
 0x44b   : > { %1448 = vrot.lane.b32.xlu0 %v2605_v52, %s2305_s9  ;;  %1238 = vrot.lane.b32.xlu1 %v2609_v54, %s2299_s23  ;;  %s2313_s23 = smov 111  }
 0x44f   : > { %1568 = vrot.lane.b32.xlu0 %v2605_v52, %s2306_s8  ;;  %1260 = vrot.lane.b32.xlu1 %v2609_v54, %s2300_s25  ;;  %s2314_s25 = smov 95  }
 0x453   : > { %1590 = vrot.lane.b32.xlu0 %v2605_v52, %s2307_s10  ;;  %1404 = vrot.lane.b32.xlu1 %v2609_v54, %s2301_s12  ;;  %s2315_s12 = smov 80  }
 0x457   : > { %1306 = vrot.lane.b32.xlu0 %v2605_v52, %s2308_s28  ;;  %1426 = vrot.lane.b32.xlu1 %v2609_v54, %s2302_s30  ;;  %s2316_s30 = smov 14  }
 0x45b   : > { %1472 = vrot.lane.b32.xlu0 %v2605_v52, %s2309_s11  ;;  %1125 = vrot.lane.b32.xlu1 %v2609_v54, %s2303_s6  ;;  %s2317_s6 = smov 126  }
 0x45f   : > { %1614 = vrot.lane.b32.xlu0 %v2605_v52, %s2310_s27  ;;  %1284 = vrot.lane.b32.xlu1 %v2609_v54, %s2304_s13  ;;  %s2318_s13 = smov 110  }
 0x461   : > { %v2672_v55 = vpop.permute.xlu0 %649  ;;  %v579_v56 = vpop.permute.xlu1 %578 }
 0x463   : > { %1005 = vrot.lane.b32.xlu0 %v2605_v52, %s2311_s17  ;;  %1450 = vrot.lane.b32.xlu1 %v2609_v54, %s2305_s9  ;;  %s2319_s9 = smov 94  }
 0x465   : > { %v2677_v57 = vpop.permute.xlu0 %673  ;;  %v581_v59 = vpop.permute.xlu1 %580 }
 0x466   : > { %v586_v5 = vsel %vm584_vm8, %v581_v59, %v579_v56  ;;  %v585_v11 = vsel %vm584_vm8, %v579_v56, %v581_v59  ;;  %v714_v56 = vcombine.high %v1911_v45, %v1911_v45  ;;  %vm961_vm8 = vcmp.lt.s32.totalorder %v2682_v60, 17 }
 0x467   : > { %1164 = vrot.lane.b32.xlu0 %v2605_v52, %s2312_s22  ;;  %1570 = vrot.lane.b32.xlu1 %v2609_v54, %s2306_s8  ;;  %v599_v25 = vmul.f32 %v1906_v6, %v586_v5  ;;  %v600_v9 = vmul.f32 %v596_v2, %v585_v11  ;;  %s2320_s8 = smov 79  }
 0x469   : > { %v2684_v61 = vpop.permute.xlu0 %697  ;;  %v602_v62 = vpop.permute.xlu1 %601 }
 0x46b   : > { %1330 = vrot.lane.b32.xlu0 %v2605_v52, %s2313_s23  ;;  %1592 = vrot.lane.b32.xlu1 %v2609_v54, %s2307_s10  ;;  %s2321_s10 = smov 13  }
 0x46d   : > { %v2690_v3 = vpop.permute.xlu0 %721  ;;  %v604_v4 = vpop.permute.xlu1 %603 }
 0x46e   : > { %v606_v7 = vsel %vm605_vm7, %v602_v62, %v604_v4  ;;  %v607_v12 = vsel %vm605_vm7, %v604_v4, %v602_v62  ;;  %vm937_vm7 = vcmp.lt.s32.totalorder %v2682_v60, 18 }
 0x46f   : > { %1496 = vrot.lane.b32.xlu0 %v2605_v52, %s2314_s25  ;;  %1308 = vrot.lane.b32.xlu1 %v2609_v54, %s2308_s28  ;;  %v621_v22 = vmul.f32 %v1907_v63, %v607_v12  ;;  %v622_v23 = vmul.f32 %v618_v13, %v606_v7  ;;  %v738_v13 = vcombine.high %v1912_v58, %v1912_v58  ;;  %s2322_s28 = smov 125  }
 0x471   : > { %v2697_v1 = vpop.permute.xlu0 %745  ;;  %v626_v10 = vpop.permute.xlu1 %625  ;;  %v623_v28 = vadd.f32 %v621_v22, %v599_v25  ;;  %v624_v32 = vadd.f32 %v622_v23, %v600_v9 }
 0x473   : > { %1638 = vrot.lane.b32.xlu0 %v2605_v52, %s2315_s12  ;;  %1474 = vrot.lane.b32.xlu1 %v2609_v54, %s2309_s11  ;;  %s2323_s11 = smov 109  }
 0x475   : > { %v2704_v26 = vpop.permute.xlu0 %767  ;;  %v628_v27 = vpop.permute.xlu1 %627 }
 0x476   : > { %v630_v29 = vsel %vm629_vm9, %v626_v10, %v628_v27  ;;  %v631_v30 = vsel %vm629_vm9, %v628_v27, %v626_v10  ;;  %vm985_vm9 = vcmp.lt.s32.totalorder %v2682_v60, 16 }
 0x477   : > { %v645_v33 = vmul.f32 %v1908_v20, %v631_v30  ;;  %v646_v34 = vmul.f32 %v642_v8, %v630_v29  ;;  %1029 = vrot.lane.b32.xlu0 %v2605_v52, %s2316_s30  ;;  %1616 = vrot.lane.b32.xlu1 %v2609_v54, %s2310_s27  ;;  %v1913_v8 = vld.sshfl [vmem:[#allocation5 + $0x1c] sm:$0x33 pattern:$0x76325410]  ;;  %s2324_s27 = smov 93  }
 0x478   : > { %v762_v30 = vcombine.high %v1913_v8, %v1913_v8 }
 0x479   : > { %v647_v36 = vadd.f32 %v645_v33, %v623_v28  ;;  %v648_v37 = vadd.f32 %v646_v34, %v624_v32  ;;  %v2711_v38 = vpop.permute.xlu0 %791  ;;  %v652_v39 = vpop.permute.xlu1 %651  ;;  %v1915_v32 = vld.sshfl [vmem:[#allocation5 + $0x24] sm:$0x33 pattern:$0x76325410] }
 0x47a   : > { %v654_v40 = vsel %vm653_vm10, %v2672_v55, %v652_v39  ;;  %v655_v41 = vsel %vm653_vm10, %v652_v39, %v2672_v55  ;;  %vm1081_vm10 = vcmp.lt.s32.totalorder %v2682_v60, 3 }
 0x47b   : > { %v669_v42 = vmul.f32 %v1909_v24, %v655_v41  ;;  %v670_v43 = vmul.f32 %v666_v31, %v654_v40  ;;  %1188 = vrot.lane.b32.xlu0 %v2605_v52, %s2317_s6  ;;  %1007 = vrot.lane.b32.xlu1 %v2609_v54, %s2311_s17  ;;  %v1914_v24 = vld.sshfl [vmem:[#allocation5 + $0x20] sm:$0x33 pattern:$0x76325410]  ;;  %s2325_s17 = smov 78  }
 0x47c   : > { %v784_v31 = vcombine.high %v1914_v24, %v1914_v24 }
 0x47d   : > { %v671_v46 = vadd.f32 %v669_v42, %v647_v36  ;;  %v672_v47 = vadd.f32 %v670_v43, %v648_v37  ;;  %v2720_v48 = vpop.permute.xlu0 %815  ;;  %v676_v49 = vpop.permute.xlu1 %675  ;;  %v808_v37 = vcombine.high %v1915_v32, %v1915_v32  ;;  %v1916_v42 = vld.sshfl [vmem:[#allocation5 + $0x28] sm:$0x33 pattern:$0x76325410] }
 0x47e   : > { %v678_v50 = vsel %vm677_vm11, %v2677_v57, %v676_v49  ;;  %v679_v51 = vsel %vm677_vm11, %v676_v49, %v2677_v57  ;;  %vm1103_vm11 = vcmp.lt.s32.totalorder %v2682_v60, 2 }
 0x47f   : > { %v693_v53 = vmul.f32 %v1910_v35, %v679_v51  ;;  %v694_v55 = vmul.f32 %v690_v44, %v678_v50  ;;  %1354 = vrot.lane.b32.xlu0 %v2605_v52, %s2318_s13  ;;  %1166 = vrot.lane.b32.xlu1 %v2609_v54, %s2312_s22  ;;  %v832_v51 = vcombine.high %v1916_v42, %v1916_v42  ;;  %s2326_s22 = smov 77  }
 0x481   : > { %v695_v59 = vadd.f32 %v693_v53, %v671_v46  ;;  %v696_v62 = vadd.f32 %v694_v55, %v672_v47  ;;  %v2729_v63 = vpop.permute.xlu0 %839  ;;  %v700_v4 = vpop.permute.xlu1 %699  ;;  %v1917_v53 = vld.sshfl [vmem:[#allocation5 + $0x2c] sm:$0x33 pattern:$0x76325410] }
 0x482   : > { %v702_v57 = vsel %vm701_vm12, %v2684_v61, %v700_v4  ;;  %v703_v6 = vsel %vm701_vm12, %v700_v4, %v2684_v61  ;;  %vm1240_vm12 = vcmp.lt.s32.totalorder %v2682_v60, 115 }
 0x483   : > { %v717_v7 = vmul.f32 %v1911_v45, %v703_v6  ;;  %v718_v12 = vmul.f32 %v714_v56, %v702_v57  ;;  %1520 = vrot.lane.b32.xlu0 %v2605_v52, %s2319_s9  ;;  %1332 = vrot.lane.b32.xlu1 %v2609_v54, %s2313_s23  ;;  %v856_v6 = vcombine.high %v1917_v53, %v1917_v53  ;;  %s1963_s23 = sshll.u32 %s2380_s4, 10  ;;  %s1789_s4 = scalar_lea.sflag [#allocation4], %s2498_s15 }
 0x485   : > { %v719_v20 = vadd.f32 %v717_v7, %v695_v59  ;;  %v720_v2 = vadd.f32 %v718_v12, %v696_v62  ;;  %v2738_v5 = vpop.permute.xlu0 %863  ;;  %v724_v10 = vpop.permute.xlu1 %723  ;;  %v1918_v7 = vld.sshfl [vmem:[#allocation5 + $0x30] sm:$0x33 pattern:$0x76325410] }
 0x486   : > { %v726_v11 = vsel %vm725_vm13, %v2690_v3, %v724_v10  ;;  %v727_v61 = vsel %vm725_vm13, %v724_v10, %v2690_v3  ;;  %vm1262_vm13 = vcmp.lt.s32.totalorder %v2682_v60, 114 }
 0x487   : > { %v741_v22 = vmul.f32 %v1912_v58, %v727_v61  ;;  %v742_v23 = vmul.f32 %v738_v13, %v726_v11  ;;  %1662 = vrot.lane.b32.xlu0 %v2605_v52, %s2320_s8  ;;  %1498 = vrot.lane.b32.xlu1 %v2609_v54, %s2314_s25  ;;  %s257_s25 = scalar_lea.vmem [#allocation7], %s1893_s16 }
 0x489   : > { %v2747_v25 = vadd.f32 %v741_v22, %v719_v20  ;;  %v2749_v9 = vadd.f32 %v742_v23, %v720_v2  ;;  %v2751_v27 = vpop.permute.xlu0 %887  ;;  %v748_v3 = vpop.permute.xlu1 %747  ;;  %v880_v22 = vcombine.high %v1918_v7, %v1918_v7  ;;  %v1919_v23 = vld.sshfl [vmem:[#allocation5 + $0x34] sm:$0x33 pattern:$0x76325410] }
 0x48a   : > { %v750_v28 = vsel %vm749_vm14, %v2697_v1, %v748_v3  ;;  %v751_v29 = vsel %vm749_vm14, %v748_v3, %v2697_v1  ;;  %vm1406_vm14 = vcmp.lt.s32.totalorder %v2682_v60, 99 }
 0x48b   : > { %1053 = vrot.lane.b32.xlu0 %v2605_v52, %s2321_s10  ;;  %1640 = vrot.lane.b32.xlu1 %v2609_v54, %s2315_s12  ;;  %v765_v35 = vmul.f32 %v1913_v8, %v751_v29  ;;  %v766_v39 = vmul.f32 %v762_v30, %v750_v28  ;;  %s1802_s12 = sshll.u32 %s257_s25, 4  ;;  %s3250_s12 = int_to_ptr.vmem [resolvable:$true] %s1802_s12 }
 0x48c   : > { %s2197_s16 = scalar_lea.vmem %s3250_s12, 1024 }
 0x48d   : > { %v2760_v33 = vpop.permute.xlu0 %911  ;;  %v770_v34 = vpop.permute.xlu1 %769  ;;  %p2198_p4 = scmp.ne.s32.totalorder %s3250_s12, %s2197_s16 }
 0x48e   : > { %v772_v36 = vsel %vm771_vm15, %v2704_v26, %v770_v34  ;;  %v773_v1 = vsel %vm771_vm15, %v770_v34, %v2704_v26  ;;  %vm1428_vm15 = vcmp.lt.s32.totalorder %v2682_v60, 98 }
 0x48f   : > { %v787_v40 = vmul.f32 %v1914_v24, %v773_v1  ;;  %v788_v41 = vmul.f32 %v784_v31, %v772_v36  ;;  %1212 = vrot.lane.b32.xlu0 %v2605_v52, %s2322_s28  ;;  %1031 = vrot.lane.b32.xlu1 %v2609_v54, %s2316_s30  ;;  %p2199_p6 = pnand %p2198_p4, %p2450_p12 }
 0x491   : > { %v789_v43 = vadd.f32 %v787_v40, %v765_v35  ;;  %v790_v44 = vadd.f32 %v788_v41, %v766_v39  ;;  %v2769_v45 = vpop.permute.xlu0 %933  ;;  %v794_v46 = vpop.permute.xlu1 %793  ;;  %v1920_v41 = vld.sshfl [vmem:[#allocation5 + $0x38] sm:$0x33 pattern:$0x76325410]  ;;  %p2200_p8 = pneg %p2199_p6 }
 0x492   : > { %v796_v26 = vsel %vm795_vm0, %v2711_v38, %v794_v46  ;;  %v797_v47 = vsel %vm795_vm0, %v794_v46, %v2711_v38  ;;  %vm1127_vm0 = vcmp.lt.s32.totalorder %v2682_v60, 1 }
 0x493   : > { %v811_v49 = vmul.f32 %v1915_v32, %v797_v47  ;;  %v812_v50 = vmul.f32 %v808_v37, %v796_v26  ;;  %1378 = vrot.lane.b32.xlu0 %v2605_v52, %s2323_s11  ;;  %1190 = vrot.lane.b32.xlu1 %v2609_v54, %s2317_s6  ;;  %v904_v32 = vcombine.high %v1919_v23, %v1919_v23 }
 0x494   : > { %v928_v47 = vcombine.high %v1920_v41, %v1920_v41 }
 0x495   : > { %v813_v55 = vadd.f32 %v811_v49, %v789_v43  ;;  %v814_v56 = vadd.f32 %v812_v50, %v790_v44  ;;  %v2778_v58 = vpop.permute.xlu0 %957  ;;  %v818_v59 = vpop.permute.xlu1 %817 }
 0x496   : > { %v820_v38 = vsel %vm819_vm1, %v2720_v48, %v818_v59  ;;  %v821_v62 = vsel %vm819_vm1, %v818_v59, %v2720_v48  ;;  %vm1286_vm1 = vcmp.lt.s32.totalorder %v2682_v60, 113 }
 0x497   : > { %v835_v4 = vmul.f32 %v1916_v42, %v821_v62  ;;  %v836_v57 = vmul.f32 %v832_v51, %v820_v38  ;;  %1544 = vrot.lane.b32.xlu0 %v2605_v52, %s2324_s27  ;;  %1356 = vrot.lane.b32.xlu1 %v2609_v54, %s2318_s13  ;;  %v1921_v42 = vld.sshfl [vmem:[#allocation5 + $0x3c] sm:$0x33 pattern:$0x76325410]  ;;  %s3244_s13 = scalar_lea.hbm %s3300_s5, %s1963_s23 }
 0x499   : > { %v837_v12 = vadd.f32 %v835_v4, %v813_v55  ;;  %v838_v13 = vadd.f32 %v836_v57, %v814_v56  ;;  %v2787_v20 = vpop.permute.xlu0 %981  ;;  %v842_v2 = vpop.permute.xlu1 %841  ;;  %v1922_v55 = vld.sshfl [vmem:[#allocation5 + $0x40] sm:$0x33 pattern:$0x76325410] }
 0x49a   : > { %v844_v48 = vsel %vm843_vm2, %v2729_v63, %v842_v2  ;;  %v845_v10 = vsel %vm843_vm2, %v842_v2, %v2729_v63  ;;  %vm1452_vm2 = vcmp.lt.s32.totalorder %v2682_v60, 97 }
 0x49b   : > { %v859_v11 = vmul.f32 %v1917_v53, %v845_v10  ;;  %v860_v61 = vmul.f32 %v856_v6, %v844_v48  ;;  %1686 = vrot.lane.b32.xlu0 %v2605_v52, %s2325_s17  ;;  %1522 = vrot.lane.b32.xlu1 %v2609_v54, %s2319_s9  ;;  %v950_v53 = vcombine.high %v1921_v42, %v1921_v42  ;;  %v1923_v6 = vld.sshfl [vmem:[#allocation5 + $0x44] sm:$0x33 pattern:$0x76325410]  ;;  %s2327_s9 = smov [#allocation7]  }
 0x49d   : > { %v861_v8 = vadd.f32 %v859_v11, %v837_v12  ;;  %v862_v24 = vadd.f32 %v860_v61, %v838_v13  ;;  %v2796_v3 = vpop.permute.xlu0 %1077  ;;  %v866_v28 = vpop.permute.xlu1 %865  ;;  %v998_v61 = vcombine.high %v1923_v6, %v1923_v6 }
 0x49e   : > { %v868_v63 = vsel %vm867_vm3, %v2738_v5, %v866_v28  ;;  %v869_v29 = vsel %vm867_vm3, %v866_v28, %v2738_v5  ;;  %vm1572_vm3 = vcmp.lt.s32.totalorder %v2682_v60, 83 }
 0x49f   : > { %v883_v30 = vmul.f32 %v1918_v7, %v869_v29  ;;  %v884_v31 = vmul.f32 %v880_v22, %v868_v63  ;;  %1710 = vrot.lane.b32.xlu0 %v2605_v52, %s2326_s22  ;;  %1664 = vrot.lane.b32.xlu1 %v2609_v54, %s2320_s8  ;;  %s2201_s8 = sshll.u32 %s2327_s9, 4  ;;  %s2202_s8 = int_to_ptr.vmem [resolvable:$false] %s2201_s8 }
 0x4a0   : > { %p2204_p10 = scmp.lt.s32.totalorder %s3250_s12, %s2202_s8 }
 0x4a1   : > { %v885_v34 = vadd.f32 %v883_v30, %v861_v8  ;;  %v886_v35 = vadd.f32 %v884_v31, %v862_v24  ;;  %v2805_v36 = vpop.permute.xlu0 %1099  ;;  %v890_v1 = vpop.permute.xlu1 %889  ;;  %v1928_v31 = vld.sshfl [vmem:[#allocation5 + $0x58] sm:$0x33 pattern:$0x76325410] }
 0x4a2   : > { %v892_v37 = vsel %vm891_vm4, %v2751_v27, %v890_v1  ;;  %v893_v5 = vsel %vm891_vm4, %v890_v1, %v2751_v27  ;;  %vm1594_vm4 = vcmp.lt.s32.totalorder %v2682_v60, 82 }
 0x4a3   : > { %v907_v39 = vmul.f32 %v1919_v23, %v893_v5  ;;  %v908_v40 = vmul.f32 %v904_v32, %v892_v37  ;;  %1055 = vrot.lane.b32.xlu1 %v2609_v54, %s2321_s10  ;;  %s2203_s10 = scalar_lea.vmem %s2202_s8, 2048 }
 0x4a4   : > { %p2205_p13 = scmp.lt.s32.totalorder %s2203_s10, %s2197_s16 }
 0x4a5   : > { %v909_v43 = vadd.f32 %v907_v39, %v885_v34  ;;  %v910_v44 = vadd.f32 %v908_v40, %v886_v35  ;;  %v2812_v46 = vpop.permute.xlu0 %1236  ;;  %v914_v26 = vpop.permute.xlu1 %913  ;;  %v1116_v39 = vcombine.high %v1928_v31, %v1928_v31 }
 0x4a6   : > { %v916_v49 = vsel %vm915_vm6, %v2760_v33, %v914_v26  ;;  %v917_v50 = vsel %vm915_vm6, %v914_v26, %v2760_v33  ;;  %vm1310_vm6 = vcmp.lt.s32.totalorder %v2682_v60, 112  ;;  %p2206_p3 = por %p2205_p13, %p2204_p10 }
 0x4a7   : > { %v2817_v27 = vadd.f32 %v909_v43, %v2747_v25  ;;  %v2820_v51 = vadd.f32 %v910_v44, %v2749_v9  ;;  %1214 = vrot.lane.b32.xlu1 %v2609_v54, %s2322_s28  ;;  %v974_v25 = vcombine.high %v1922_v55, %v1922_v55  ;;  %v931_v62 = vmul.f32 %v1920_v41, %v917_v50  ;;  %v1935_v50 = vld.sshfl [vmem:[#allocation5 + $0x74] sm:$0x33 pattern:$0x76325410] }
 0x4a8   : > { %v932_v9 = vmul.f32 %v928_v47, %v916_v49  ;;  %v1934_v49 = vld.sshfl [vmem:[#allocation5 + $0x70] sm:$0x33 pattern:$0x76325410]  ;;  %p2207_p7 = pnand %p2206_p3, %p2200_p8 }
 0x4a9   : > { %3336 = vst [vmem:[#allocation19_spill] sm:$0xff] %v2817_v27  ;;  %3337 = vst [vmem:[#allocation20_spill] sm:$0xff] %v2820_v51  ;;  %v2825_v56 = vpop.permute.xlu0 %1258  ;;  %v936_v59 = vpop.permute.xlu1 %935 }
 0x4aa   : > { %v938_v38 = vsel %vm937_vm7, %v2769_v45, %v936_v59  ;;  %v939_v33 = vsel %vm937_vm7, %v936_v59, %v2769_v45  ;;  %vm1476_vm7 = vcmp.lt.s32.totalorder %v2682_v60, 96 }
 0x4ab   : > { %v953_v4 = vmul.f32 %v1921_v42, %v939_v33  ;;  %v954_v57 = vmul.f32 %v950_v53, %v938_v38  ;;  %1380 = vrot.lane.b32.xlu1 %v2609_v54, %s2323_s11 }
 0x4ad   : > { %v955_v7 = vadd.f32 %v953_v4, %v931_v62  ;;  %v956_v12 = vadd.f32 %v954_v57, %v932_v9  ;;  %v2832_v13 = vpop.permute.xlu0 %1402  ;;  %v960_v2 = vpop.permute.xlu1 %959  ;;  %v1253_v62 = vcombine.high %v1934_v49, %v1934_v49 }
 0x4ae   : > { %v962_v48 = vsel %vm961_vm8, %v2778_v58, %v960_v2  ;;  %v963_v45 = vsel %vm961_vm8, %v960_v2, %v2778_v58  ;;  %v1927_v58 = vld.sshfl [vmem:[#allocation5 + $0x54] sm:$0x33 pattern:$0x76325410]  ;;  %vm1618_vm8 = vcmp.lt.s32.totalorder %v2682_v60, 81 }
 0x4af   : > { %v977_v10 = vmul.f32 %v1922_v55, %v963_v45  ;;  %v978_v11 = vmul.f32 %v974_v25, %v962_v48  ;;  %1546 = vrot.lane.b32.xlu1 %v2609_v54, %s2324_s27  ;;  %v1094_v5 = vcombine.high %v1927_v58, %v1927_v58  ;;  %v1941_v45 = vld.sshfl [vmem:[#allocation5 + $0x8c] sm:$0x33 pattern:$0x76325410] }
 0x4b1   : > { %v979_v22 = vadd.f32 %v977_v10, %v955_v7  ;;  %v980_v23 = vadd.f32 %v978_v11, %v956_v12  ;;  %v2839_v8 = vpop.permute.xlu0 %1424  ;;  %v984_v24 = vpop.permute.xlu1 %983  ;;  %v1942_v10 = vld.sshfl [vmem:[#allocation5 + $0x90] sm:$0x33 pattern:$0x76325410] }
 0x4b2   : > { %v986_v28 = vsel %vm985_vm9, %v2787_v20, %v984_v24  ;;  %v987_v63 = vsel %vm985_vm9, %v984_v24, %v2787_v20  ;;  %vm1009_vm9 = vcmp.lt.s32.totalorder %v2682_v60, 15 }
 0x4b3   : > { %v1001_v29 = vmul.f32 %v1923_v6, %v987_v63  ;;  %v1002_v30 = vmul.f32 %v998_v61, %v986_v28  ;;  %1688 = vrot.lane.b32.xlu1 %v2609_v54, %s2325_s17  ;;  %v1419_v28 = vcombine.high %v1941_v45, %v1941_v45  ;;  %v1929_v63 = vld.sshfl [vmem:[#allocation5 + $0x5c] sm:$0x33 pattern:$0x76325410] }
 0x4b5   : > { %v2846_v32 = vadd.f32 %v1001_v29, %v979_v22  ;;  %v2848_v34 = vadd.f32 %v1002_v30, %v980_v23  ;;  %v2850_v35 = vpop.permute.xlu0 %1123  ;;  %v1080_v1 = vpop.permute.xlu1 %1079 }
 0x4b6   : > { %v1082_v37 = vsel %vm1081_vm10, %v2796_v3, %v1080_v1  ;;  %v1083_v20 = vsel %vm1081_vm10, %v1080_v1, %v2796_v3  ;;  %v1140_v1 = vcombine.high %v1929_v63, %v1929_v63  ;;  %vm1168_vm10 = vcmp.lt.s32.totalorder %v2682_v60, 127 }
 0x4b7   : > { %1712 = vrot.lane.b32.xlu1 %v2609_v54, %s2326_s22  ;;  %v1097_v44 = vmul.f32 %v1927_v58, %v1083_v20  ;;  %v1098_v26 = vmul.f32 %v1094_v5, %v1082_v37 }
 0x4b9   : > { %v2857_v40 = vpop.permute.xlu0 %1282  ;;  %v1102_v41 = vpop.permute.xlu1 %1101 }
 0x4ba   : > { %v1104_v42 = vsel %vm1103_vm11, %v2805_v36, %v1102_v41  ;;  %v1105_v43 = vsel %vm1103_vm11, %v1102_v41, %v2805_v36  ;;  %v1275_v36 = vcombine.high %v1935_v50, %v1935_v50  ;;  %vm1334_vm11 = vcmp.lt.s32.totalorder %v2682_v60, 111 }
 0x4bb   : > { %v1119_v47 = vmul.f32 %v1928_v31, %v1105_v43  ;;  %v1120_v3 = vmul.f32 %v1116_v39, %v1104_v42 }
 0x4bd   : > { %v1121_v53 = vadd.f32 %v1119_v47, %v1097_v44  ;;  %v1122_v55 = vadd.f32 %v1120_v3, %v1098_v26  ;;  %v2862_v59 = vpop.permute.xlu0 %1448  ;;  %v1239_v38 = vpop.permute.xlu1 %1238 }
 0x4be   : > { %v1241_v33 = vsel %vm1240_vm12, %v2812_v46, %v1239_v38  ;;  %v1242_v25 = vsel %vm1240_vm12, %v1239_v38, %v2812_v46  ;;  %vm1500_vm12 = vcmp.lt.s32.totalorder %v2682_v60, 95 }
 0x4bf   : > { %v1256_v7 = vmul.f32 %v1934_v49, %v1241_v33  ;;  %v1257_v12 = vmul.f32 %v1253_v62, %v1242_v25 }
 0x4c1   : > { %v2867_v9 = vpop.permute.xlu0 %1568  ;;  %v1261_v4 = vpop.permute.xlu1 %1260 }
 0x4c2   : > { %v1263_v57 = vsel %vm1262_vm13, %v2825_v56, %v1261_v4  ;;  %v1264_v6 = vsel %vm1262_vm13, %v1261_v4, %v2825_v56  ;;  %v1441_v56 = vcombine.high %v1942_v10, %v1942_v10  ;;  %vm1033_vm13 = vcmp.lt.s32.totalorder %v2682_v60, 14 }
 0x4c3   : > { %v1278_v2 = vmul.f32 %v1935_v50, %v1263_v57  ;;  %v1279_v48 = vmul.f32 %v1275_v36, %v1264_v6  ;;  %v1943_v50 = vld.sshfl [vmem:[#allocation5 + $0x94] sm:$0x33 pattern:$0x76325410] }
 0x4c5   : > { %v1280_v46 = vadd.f32 %v1278_v2, %v1256_v7  ;;  %v1281_v11 = vadd.f32 %v1279_v48, %v1257_v12  ;;  %v2872_v61 = vpop.permute.xlu0 %1590  ;;  %v1405_v22 = vpop.permute.xlu1 %1404 }
 0x4c6   : > { %v1407_v23 = vsel %vm1406_vm14, %v2832_v13, %v1405_v22  ;;  %v1408_v24 = vsel %vm1406_vm14, %v1405_v22, %v2832_v13  ;;  %v1936_v13 = vld.sshfl [vmem:[#allocation5 + $0x78] sm:$0x33 pattern:$0x76325410]  ;;  %vm1192_vm14 = vcmp.lt.s32.totalorder %v2682_v60, 126 }
 0x4c7   : > { %v1422_v37 = vmul.f32 %v1941_v45, %v1407_v23  ;;  %v1423_v20 = vmul.f32 %v1419_v28, %v1408_v24  ;;  %v1948_v22 = vld.sshfl [vmem:[#allocation5 + $0xa8] sm:$0x33 pattern:$0x76325410] }
 0x4c9   : > { %v2877_v29 = vpop.permute.xlu0 %1306  ;;  %v1427_v30 = vpop.permute.xlu1 %1426 }
 0x4ca   : > { %v1429_v58 = vsel %vm1428_vm15, %v2839_v8, %v1427_v30  ;;  %v1430_v31 = vsel %vm1428_vm15, %v1427_v30, %v2839_v8  ;;  %v1299_v8 = vcombine.high %v1936_v13, %v1936_v13  ;;  %v1937_v30 = vld.sshfl [vmem:[#allocation5 + $0x7c] sm:$0x33 pattern:$0x76325410]  ;;  %vm1057_vm15 = vcmp.lt.s32.totalorder %v2682_v60, 13 }
 0x4cb   : > { %v1444_v5 = vmul.f32 %v1942_v10, %v1429_v58  ;;  %v1445_v39 = vmul.f32 %v1441_v56, %v1430_v31 }
 0x4cd   : > { %v1446_v41 = vadd.f32 %v1444_v5, %v1422_v37  ;;  %v1447_v42 = vadd.f32 %v1445_v39, %v1423_v20  ;;  %v2882_v43 = vpop.permute.xlu0 %1472  ;;  %v1126_v44 = vpop.permute.xlu1 %1125  ;;  %v1323_v20 = vcombine.high %v1937_v30, %v1937_v30 }
 0x4ce   : > { %v1128_v26 = vsel %vm1127_vm0, %v2850_v35, %v1126_v44  ;;  %v1129_v47 = vsel %vm1127_vm0, %v1126_v44, %v2850_v35  ;;  %v1465_v35 = vcombine.high %v1943_v50, %v1943_v50  ;;  %vm1216_vm0 = vcmp.lt.s32.totalorder %v2682_v60, 125 }
 0x4cf   : > { %v1143_v3 = vmul.f32 %v1929_v63, %v1129_v47  ;;  %v1144_v49 = vmul.f32 %v1140_v1, %v1128_v26  ;;  %v1585_v63 = vcombine.high %v1948_v22, %v1948_v22 }
 0x4d1   : > { %v2887_v38 = vadd.f32 %v1143_v3, %v1121_v53  ;;  %v2889_v33 = vadd.f32 %v1144_v49, %v1122_v55  ;;  %v2891_v25 = vpop.permute.xlu0 %1614  ;;  %v1285_v62 = vpop.permute.xlu1 %1284 }
 0x4d2   : > { %v1287_v36 = vsel %vm1286_vm1, %v2857_v40, %v1285_v62  ;;  %v1288_v4 = vsel %vm1286_vm1, %v1285_v62, %v2857_v40  ;;  %v1949_v40 = vld.sshfl [vmem:[#allocation5 + $0xac] sm:$0x33 pattern:$0x76325410]  ;;  %vm1358_vm1 = vcmp.lt.s32.totalorder %v2682_v60, 110 }
 0x4d3   : > { %v1302_v57 = vmul.f32 %v1936_v13, %v1287_v36  ;;  %v1303_v6 = vmul.f32 %v1299_v8, %v1288_v4 }
 0x4d5   : > { %v1304_v7 = vadd.f32 %v1302_v57, %v1280_v46  ;;  %v1305_v12 = vadd.f32 %v1303_v6, %v1281_v11  ;;  %v2896_v2 = vpop.permute.xlu0 %1005  ;;  %v1451_v53 = vpop.permute.xlu1 %1450 }
 0x4d6   : > { %v1453_v55 = vsel %vm1452_vm2, %v2862_v59, %v1451_v53  ;;  %v1454_v48 = vsel %vm1452_vm2, %v1451_v53, %v2862_v59  ;;  %v1607_v59 = vcombine.high %v1949_v40, %v1949_v40  ;;  %vm1642_vm2 = vcmp.lt.s32.totalorder %v2682_v60, 80 }
 0x4d7   : > { %v1468_v45 = vmul.f32 %v1943_v50, %v1453_v55  ;;  %v1469_v10 = vmul.f32 %v1465_v35, %v1454_v48  ;;  %v1930_v48 = vld.sshfl [vmem:[#allocation5 + $0x60] sm:$0x33 pattern:$0x76325410] }
 0x4d9   : > { %v2901_v23 = vadd.f32 %v1468_v45, %v1446_v41  ;;  %v2903_v24 = vadd.f32 %v1469_v10, %v1447_v42  ;;  %v2905_v28 = vpop.permute.xlu0 %1164  ;;  %v1571_v46 = vpop.permute.xlu1 %1570 }
 0x4da   : > { %v1573_v11 = vsel %vm1572_vm3, %v2867_v9, %v1571_v46  ;;  %v1574_v56 = vsel %vm1572_vm3, %v1571_v46, %v2867_v9  ;;  %v1157_v46 = vcombine.high %v1930_v48, %v1930_v48  ;;  %vm1524_vm3 = vcmp.lt.s32.totalorder %v2682_v60, 94 }
 0x4db   : > { %v1588_v5 = vmul.f32 %v1948_v22, %v1573_v11  ;;  %v1589_v39 = vmul.f32 %v1585_v63, %v1574_v56  ;;  %v1944_v22 = vld.sshfl [vmem:[#allocation5 + $0x98] sm:$0x33 pattern:$0x76325410] }
 0x4dc   : > { %v2953_v11 = vld.sshfl [vmem:[#allocation5 + $0x48] sm:$0x33 pattern:$0x76325410] }
 0x4dd   : > { %v2910_v58 = vpop.permute.xlu0 %1330  ;;  %v1593_v31 = vpop.permute.xlu1 %1592  ;;  %v2955_v56 = vld.sshfl [vmem:[#allocation5 + $0x64] sm:$0x33 pattern:$0x76325410] }
 0x4de   : > { %v1595_v1 = vsel %vm1594_vm4, %v2872_v61, %v1593_v31  ;;  %v1596_v37 = vsel %vm1594_vm4, %v1593_v31, %v2872_v61  ;;  %v2957_v63 = vld.sshfl [vmem:[#allocation5 + $0x80] sm:$0x33 pattern:$0x76325410]  ;;  %vm1382_vm4 = vcmp.lt.s32.totalorder %v2682_v60, 109 }
 0x4df   : > { %v1610_v13 = vmul.f32 %v1949_v40, %v1595_v1  ;;  %v1611_v41 = vmul.f32 %v1607_v59, %v1596_v37  ;;  %v2951_v40 = vld.sshfl [vmem:[#allocation5 + $0xb0] sm:$0x33 pattern:$0x76325410]  ;;  %v1347_v19 = vcombine.high %v2957_v63, %v2957_v63 }
 0x4e0   : > { %v2964_v31 = vld.sshfl [vmem:[#allocation5 + $0xb4] sm:$0x33 pattern:$0x76325410] }
 0x4e1   : > { %v2915_v9 = vadd.f32 %v1610_v13, %v1588_v5  ;;  %v2917_v42 = vadd.f32 %v1611_v41, %v1589_v39  ;;  %v2919_v44 = vpop.permute.xlu0 %1496  ;;  %v1309_v26 = vpop.permute.xlu1 %1308  ;;  %3341 = vst [vmem:[#allocation24_spill] sm:$0xff] %v2964_v31  ;;  %v2966_v1 = vld.sshfl [vmem:[#allocation5 + $0x4c] sm:$0x33 pattern:$0x76325410]  ;;  %v1160_v5 = vmul.f32 %v1930_v48, %v2605_v52  ;;  %v1489_v13 = vcombine.high %v1944_v22, %v1944_v22 }
 0x4e2   : > { %v1311_v47 = vsel %vm1310_vm6, %v2877_v29, %v1309_v26  ;;  %v1312_v3 = vsel %vm1310_vm6, %v1309_v26, %v2877_v29  ;;  %v2972_v39 = vld.sshfl [vmem:[#allocation5 + $0x68] sm:$0x33 pattern:$0x76325410]  ;;  %v1181_v41 = vcombine.high %v2955_v56, %v2955_v56  ;;  %v1046_v17 = vcombine.high %v2966_v1, %v2966_v1 }
 0x4e3   : > { %3338 = vst [vmem:[#allocation21_spill] sm:$0xff] %v2915_v9  ;;  %3339 = vst [vmem:[#allocation22_spill] sm:$0xff] %v2917_v42  ;;  %v1326_v49 = vmul.f32 %v1937_v30, %v1311_v47  ;;  %v1327_v61 = vmul.f32 %v1323_v20, %v1312_v3  ;;  %v2962_v30 = vld.sshfl [vmem:[#allocation5 + $0x9c] sm:$0x33 pattern:$0x76325410]  ;;  %v1161_v20 = vmul.f32 %v1157_v46, %v2609_v54 }
 0x4e4   : > { %v2978_v26 = vld.sshfl [vmem:[#allocation5 + $0x84] sm:$0x33 pattern:$0x76325410]  ;;  %v1513_v0 = vcombine.high %v2962_v30, %v2962_v30  ;;  %v1205_v42 = vcombine.high %v2972_v39, %v2972_v39  ;;  %v1162_v27 = vadd.f32 %v1160_v5, %v2887_v38  ;;  %vm1666_vm6 = vcmp.lt.s32.totalorder %v2682_v60, 79 }
 0x4e5   : > { %v2923_v8 = vadd.f32 %v1326_v49, %v1304_v7  ;;  %v2925_v50 = vadd.f32 %v1327_v61, %v1305_v12  ;;  %v1475_v62 = vpop.permute.xlu1 %1474  ;;  %v2927_v36 = vpop.permute.xlu0 %1638  ;;  %v2980_v47 = vld.sshfl [vmem:[#allocation5 + $0xa0] sm:$0x33 pattern:$0x76325410]  ;;  %v1022_v49 = vcombine.high %v2953_v11, %v2953_v11  ;;  %v1163_v51 = vadd.f32 %v1161_v20, %v2889_v33 }
 0x4e6   : > { %v2982_v3 = vld.sshfl [vmem:[#allocation5 + $0xb8] sm:$0x33 pattern:$0x76325410]  ;;  %v1477_v52 = vsel %vm1476_vm7, %v2882_v43, %v1475_v62  ;;  %v1478_v54 = vsel %vm1476_vm7, %v1475_v62, %v2882_v43  ;;  %vm1548_vm7 = vcmp.lt.s32.totalorder %v2682_v60, 93 }
 0x4e7   : > { %3342 = vst [vmem:[#allocation25_spill] sm:$0xff] %v2982_v3  ;;  %v2993_v61 = vld.sshfl [vmem:[#allocation5 + $0x50] sm:$0x33 pattern:$0x76325410]  ;;  %v1492_v21 = vmul.f32 %v1944_v22, %v1477_v52  ;;  %v1493_v14 = vmul.f32 %v1489_v13, %v1478_v54  ;;  %v1703_v3 = vcombine.high %v3016_v18, %v3016_v18 }
 0x4e8   : > { %v2995_v48 = vld.sshfl [vmem:[#allocation5 + $0x6c] sm:$0x33 pattern:$0x76325410]  ;;  %v1070_v13 = vcombine.high %v2993_v61, %v2993_v61 }
 0x4e9   : > { %v2929_v4 = vpop.permute.xlu1 %1616  ;;  %v2931_v57 = vpop.permute.xlu0 %1029  ;;  %v2997_v46 = vld.sshfl [vmem:[#allocation5 + $0x88] sm:$0x33 pattern:$0x76325410]  ;;  %v1494_v31 = vadd.f32 %v1492_v21, %v2901_v23  ;;  %v1495_v52 = vadd.f32 %v1493_v14, %v2903_v24 }
 0x4ea   : > { %v3007_v62 = vld.sshfl [vmem:[#allocation5 + $0xa4] sm:$0x33 pattern:$0x76325410]  ;;  %v1619_v33 = vsel %vm1618_vm8, %v2891_v25, %v2929_v4  ;;  %v1620_v14 = vsel %vm1618_vm8, %v2929_v4, %v2891_v25  ;;  %vm1690_vm8 = vcmp.lt.s32.totalorder %v2682_v60, 78 }
 0x4eb   : > { %v3021_v9 = vld.sshfl [vmem:[#allocation5 + $0xc0] sm:$0x33 pattern:$0x76325410]  ;;  %v1561_v15 = vcombine.high %v3007_v62, %v3007_v62 }
 0x4ed   : > { %v2933_v6 = vpop.permute.xlu1 %1007  ;;  %v2937_v53 = vpop.permute.xlu0 %1188 }
 0x4ee   : > { %v1010_v54 = vsel %vm1009_vm9, %v2896_v2, %v2933_v6  ;;  %v1011_v38 = vsel %vm1009_vm9, %v2933_v6, %v2896_v2  ;;  %vm1714_vm9 = vcmp.lt.s32.totalorder %v2682_v60, 77 }
 0x4f1   : > { %v2935_v35 = vpop.permute.xlu1 %1166  ;;  %v2941_v55 = vpop.permute.xlu0 %1354 }
 0x4f2   : > { %v1169_v21 = vsel %vm1168_vm10, %v2905_v28, %v2935_v35  ;;  %v1170_v2 = vsel %vm1168_vm10, %v2935_v35, %v2905_v28  ;;  %v1025_v35 = vmul.f32 %v2953_v11, %v1011_v38 }
 0x4f3   : > { %v1185_v20 = vmul.f32 %v1181_v41, %v1170_v2  ;;  %v3343_v41 = vcombine.high %v2951_v40, %v2951_v40 }
 0x4f5   : > { %v2939_v29 = vpop.permute.xlu1 %1332  ;;  %v2947_v45 = vpop.permute.xlu0 %1520  ;;  %v3121_v38 = vmul.f32 %v3343_v41, %v1620_v14  ;;  %v1187_v14 = vadd.f32 %v1185_v20, %v1163_v51  ;;  %v3347_v41 = vld [vmem:[#allocation24_spill] sm:$0xff] }
 0x4f6   : > { %v1335_v23 = vsel %vm1334_vm11, %v2910_v58, %v2939_v29  ;;  %v1336_v25 = vsel %vm1334_vm11, %v2939_v29, %v2910_v58  ;;  %v1026_v58 = vmul.f32 %v1022_v49, %v1010_v54 }
 0x4f7   : > { %v1350_v49 = vmul.f32 %v2957_v63, %v1335_v23  ;;  %v1351_v54 = vmul.f32 %v1347_v19, %v1336_v25 }
 0x4f9   : > { %v2943_v7 = vpop.permute.xlu1 %1498  ;;  %v2960_v59 = vpop.permute.xlu0 %1662 }
 0x4fa   : > { %3340 = vst [vmem:[#allocation23_spill] sm:$0xff] %v2960_v59  ;;  %v1727_v59 = vcombine.high %v3021_v9, %v3021_v9  ;;  %v1501_v24 = vsel %vm1500_vm12, %v2919_v44, %v2943_v7  ;;  %v1502_v28 = vsel %vm1500_vm12, %v2943_v7, %v2919_v44  ;;  %v1184_v7 = vmul.f32 %v2955_v56, %v1169_v21 }
 0x4fb   : > { %v3116_v56 = vmul.f32 %v2951_v40, %v1619_v33  ;;  %v1028_v40 = vadd.f32 %v1026_v58, %v2848_v34 }
 0x4fc   : > { %v1186_v33 = vadd.f32 %v1184_v7, %v1162_v27 }
 0x4fd   : > { %v2945_v12 = vpop.permute.xlu1 %1640  ;;  %v1054_v16 = vpop.permute.xlu0 %1053 }
 0x501   : > { %v2949_v10 = vpop.permute.xlu1 %1031  ;;  %v1213_v4 = vpop.permute.xlu0 %1212 }
 0x502   : > { %v1034_v29 = vsel %vm1033_vm13, %v2931_v57, %v2949_v10  ;;  %v1035_v44 = vsel %vm1033_vm13, %v2949_v10, %v2931_v57  ;;  %v1516_v57 = vmul.f32 %v2962_v30, %v1501_v24  ;;  %v1517_v10 = vmul.f32 %v1513_v0, %v1502_v28 }
 0x503   : > { %v1049_v21 = vmul.f32 %v2966_v1, %v1035_v44  ;;  %v1050_v2 = vmul.f32 %v1046_v17, %v1034_v29  ;;  %v1352_v17 = vadd.f32 %v1350_v49, %v2923_v8 }
 0x504   : > { %v1519_v23 = vadd.f32 %v1517_v10, %v1495_v52  ;;  %v1644_v52 = vsel %vm1642_vm2, %v2945_v12, %v2927_v36 }
 0x505   : > { %v2968_v37 = vpop.permute.xlu1 %1190  ;;  %v1379_v1 = vpop.permute.xlu0 %1378  ;;  %v1052_v24 = vadd.f32 %v1050_v2, %v1028_v40 }
 0x506   : > { %v1193_v5 = vsel %vm1192_vm14, %v2937_v53, %v2968_v37  ;;  %v1194_v11 = vsel %vm1192_vm14, %v2968_v37, %v2937_v53  ;;  %v1027_v37 = vadd.f32 %v1025_v35, %v2846_v32 }
 0x507   : > { %v1208_v63 = vmul.f32 %v2972_v39, %v1193_v5  ;;  %v1209_v19 = vmul.f32 %v1205_v42, %v1194_v11  ;;  %v1353_v39 = vadd.f32 %v1351_v54, %v2925_v50  ;;  %v1518_v42 = vadd.f32 %v1516_v57, %v1494_v31 }
 0x508   : > { %v1051_v25 = vadd.f32 %v1049_v21, %v1027_v37  ;;  %v3344_v31 = vcombine.high %v2995_v48, %v2995_v48 }
 0x509   : > { %v3005_v43 = vpop.permute.xlu1 %1356  ;;  %v1210_v32 = vadd.f32 %v1208_v63, %v1186_v33  ;;  %v1211_v35 = vadd.f32 %v1209_v19, %v1187_v14  ;;  %v3350_v19 = vld [vmem:[#allocation19_spill] sm:$0xff]  ;;  %v3352_v33 = vcombine.high %v2997_v46, %v2997_v46 }
 0x50a   : > { %v1359_v34 = vsel %vm1358_vm1, %v2941_v55, %v3005_v43  ;;  %v1360_v8 = vsel %vm1358_vm1, %v3005_v43, %v2941_v55  ;;  %v1545_v43 = vpop.permute.xlu0 %1544 }
 0x50b   : > { %v1374_v5 = vmul.f32 %v2978_v26, %v1359_v34  ;;  %v3355_v34 = vld [vmem:[#allocation25_spill] sm:$0xff] }
 0x50d   : > { %v3030_v22 = vpop.permute.xlu1 %1522 }
 0x50e   : > { %v1525_v55 = vsel %vm1524_vm3, %v2947_v45, %v3030_v22 }
 0x511   : > { %v3092_v6 = vpop.permute.xlu1 %1664 }
 0x515   : > { %v1056_v53 = vpop.permute.xlu1 %1055 }
 0x516   : > { %v1058_v0 = vsel %vm1057_vm15, %v1054_v16, %v1056_v53  ;;  %v1059_v30 = vsel %vm1057_vm15, %v1056_v53, %v1054_v16  ;;  %v3349_v53 = vld [vmem:[#allocation23_spill] sm:$0xff] }
 0x517   : > { %v1073_v28 = vmul.f32 %v2993_v61, %v1059_v30  ;;  %v1074_v16 = vmul.f32 %v1070_v13, %v1058_v0  ;;  %v1643_v13 = vsel %vm1642_vm2, %v2927_v36, %v2945_v12  ;;  %v3345_v36 = vcombine.high %v2978_v26, %v2978_v26  ;;  %v3351_v30 = vld [vmem:[#allocation20_spill] sm:$0xff] }
 0x518   : > { %v1658_v21 = vmul.f32 %v3347_v41, %v1643_v13  ;;  %v3348_v26 = vcombine.high %v3347_v41, %v3347_v41  ;;  %v1667_v63 = vsel %vm1666_vm6, %v3349_v53, %v3092_v6 }
 0x519   : > { %v1215_v29 = vpop.permute.xlu1 %1214  ;;  %v1076_v58 = vadd.f32 %v1074_v16, %v1052_v24  ;;  %v1375_v12 = vmul.f32 %v3345_v36, %v1360_v8  ;;  %v1682_v8 = vmul.f32 %v3355_v34, %v1667_v63 }
 0x51a   : > { %v1217_v27 = vsel %vm1216_vm0, %v1213_v4, %v1215_v29  ;;  %v1218_v51 = vsel %vm1216_vm0, %v1215_v29, %v1213_v4  ;;  %v1075_v4 = vadd.f32 %v1073_v28, %v1051_v25  ;;  %v1659_v2 = vmul.f32 %v3348_v26, %v1644_v52 }
 0x51b   : > { %v1232_v50 = vmul.f32 %v2995_v48, %v1217_v27  ;;  %v1233_v61 = vmul.f32 %v3344_v31, %v1218_v51  ;;  %v1526_v48 = vsel %vm1524_vm3, %v3030_v22, %v2947_v45  ;;  %v1540_v45 = vmul.f32 %v2980_v47, %v1525_v55 }
 0x51c   : > { %v3346_v22 = vcombine.high %v2980_v47, %v2980_v47  ;;  %v1668_v47 = vsel %vm1666_vm6, %v3092_v6, %v3349_v53  ;;  %v1376_v25 = vadd.f32 %v1374_v5, %v1352_v17  ;;  %v1377_v24 = vadd.f32 %v1375_v12, %v1353_v39  ;;  %v1687_v6 = vpop.permute.xlu0 %1686  ;;  %v3354_v17 = vld [vmem:[#allocation22_spill] sm:$0xff] }
 0x51d   : > { %v1234_v44 = vadd.f32 %v1232_v50, %v1210_v32  ;;  %v1235_v7 = vadd.f32 %v1233_v61, %v1211_v35  ;;  %v1381_v20 = vpop.permute.xlu1 %1380  ;;  %v1542_v29 = vadd.f32 %v1540_v45, %v1518_v42  ;;  %v1637_v39 = vadd.f32 %v3121_v38, %v3354_v17 }
 0x51e   : > { %v1383_v11 = vsel %vm1382_vm4, %v1379_v1, %v1381_v20  ;;  %v1384_v49 = vsel %vm1382_vm4, %v1381_v20, %v1379_v1  ;;  %v1541_v54 = vmul.f32 %v3346_v22, %v1526_v48  ;;  %v3356_v50 = vcombine.high %v3355_v34, %v3355_v34 }
 0x51f   : > { %v1736_v57 = vadd.f32 %v1234_v44, %v1075_v4  ;;  %v1737_v10 = vadd.f32 %v1235_v7, %v1076_v58  ;;  %v1398_v40 = vmul.f32 %v2997_v46, %v1383_v11  ;;  %v1399_v14 = vmul.f32 %v3352_v33, %v1384_v49  ;;  %v3353_v46 = vld [vmem:[#allocation21_spill] sm:$0xff] }
 0x520   : > { %v1543_v32 = vadd.f32 %v1541_v54, %v1519_v23  ;;  %v1636_v51 = vadd.f32 %v3116_v56, %v3353_v46  ;;  %v1683_v31 = vmul.f32 %v3356_v50, %v1668_v47  ;;  %v1711_v58 = vpop.permute.xlu0 %1710 }
 0x521   : > { %v1740_v0 = vadd.f32 %v1736_v57, %v3350_v19  ;;  %v1741_v37 = vadd.f32 %v1737_v10, %v3351_v30  ;;  %v1547_v1 = vpop.permute.xlu1 %1546  ;;  %v1400_v42 = vadd.f32 %v1398_v40, %v1376_v25  ;;  %v1401_v23 = vadd.f32 %v1399_v14, %v1377_v24 }
 0x522   : > { %v1549_v28 = vsel %vm1548_vm7, %v1545_v43, %v1547_v1  ;;  %v1550_v16 = vsel %vm1548_vm7, %v1547_v1, %v1545_v43  ;;  %v1660_v55 = vadd.f32 %v1658_v21, %v1636_v51  ;;  %v3360_v51 = vld [vmem:[#allocation15_spill] sm:$0xff] }
 0x523   : > { %v1564_v35 = vmul.f32 %v3007_v62, %v1549_v28  ;;  %v1565_v27 = vmul.f32 %v1561_v15, %v1550_v16  ;;  %v1661_v62 = vadd.f32 %v1659_v2, %v1637_v39  ;;  %v3361_v39 = vld [vmem:[#allocation14_spill] sm:$0xff] }
 0x524   : > { %v1684_v44 = vadd.f32 %v1682_v8, %v1660_v55  ;;  %v3362_v8 = vld [vmem:[#allocation12_spill] sm:$0xff] }
 0x525   : > { %v1566_v61 = vadd.f32 %v1564_v35, %v1542_v29  ;;  %v1567_v13 = vadd.f32 %v1565_v27, %v1543_v32  ;;  %v1689_v52 = vpop.permute.xlu1 %1688  ;;  %v1685_v7 = vadd.f32 %v1683_v31, %v1661_v62  ;;  %v3358_v32 = vld [vmem:[#allocation11_spill] sm:$0xff]  ;;  %v3359_v27 = vld [vmem:[#allocation17_spill] sm:$0xff]  ;;  %v3363_v31 = vld [vmem:[#allocation18_spill] sm:$0xff] }
 0x526   : > { %v1691_v15 = vsel %vm1690_vm8, %v1687_v6, %v1689_v52  ;;  %v1692_v56 = vsel %vm1690_vm8, %v1689_v52, %v1687_v6  ;;  %v3357_v6 = vld [vmem:[#allocation13_spill] sm:$0xff] }
 0x527   : > { %v1738_v38 = vadd.f32 %v1566_v61, %v1400_v42  ;;  %v1739_v48 = vadd.f32 %v1567_v13, %v1401_v23  ;;  %v1706_v43 = vmul.f32 %v3016_v18, %v1691_v15  ;;  %v1707_v4 = vmul.f32 %v1703_v3, %v1692_v56  ;;  %v3364_v23 = vld [vmem:[#allocation16_spill] sm:$0xff] }
 0x529   : > { %v1713_v20 = vpop.permute.xlu1 %1712  ;;  %v1708_v12 = vadd.f32 %v1706_v43, %v1684_v44  ;;  %v1709_v11 = vadd.f32 %v1707_v4, %v1685_v7 }
 0x52a   : > { %v1715_v5 = vsel %vm1714_vm9, %v1711_v58, %v1713_v20  ;;  %v1716_v36 = vsel %vm1714_vm9, %v1713_v20, %v1711_v58 }
 0x52b   : > { %v1730_v49 = vmul.f32 %v3021_v9, %v1715_v5  ;;  %v1731_v45 = vmul.f32 %v1727_v59, %v1716_v36 }
 0x52d   : > { %v1732_v18 = vadd.f32 %v1730_v49, %v1708_v12  ;;  %v1733_v3 = vadd.f32 %v1731_v45, %v1709_v11 }
 0x52f   : > { %v1742_v22 = vadd.f32 %v1738_v38, %v1732_v18  ;;  %v1743_v54 = vadd.f32 %v1739_v48, %v1733_v3 }
 0x531   : > { %v1744_v57 = vadd.f32 %v1742_v22, %v1740_v0  ;;  %v1745_v10 = vadd.f32 %v1743_v54, %v1741_v37 }
 0x533   : > { %v1746_v41 = vsel %vm396_vm5, %v1744_v57, 0.0  ;;  %v1753_v21 = vsel %vm396_vm5, %v1745_v10, 0.0 }
 0x534   : > { %v1747_v60 = vrot.slane %v1746_v41, 4  ;;  %v1754_v26 = vrot.slane %v1753_v21, 4 }
 0x536   : > { %v1748_v2 = vadd.f32 %v1747_v60, %v1746_v41  ;;  %v1755_v53 = vadd.f32 %v1754_v26, %v1753_v21 }
 0x538   : > { %v1749_v63 = vrot.slane %v1748_v2, 2  ;;  %v1756_v47 = vrot.slane %v1755_v53, 2 }
 0x53a   : > { %v1750_v19 = vadd.f32 %v1749_v63, %v1748_v2  ;;  %v1757_v9 = vadd.f32 %v1756_v47, %v1755_v53 }
 0x53c   : > { %v1751_v59 = vrot.slane %v1750_v19, 1  ;;  %v1758_v30 = vrot.slane %v1757_v9, 1 }
 0x53e   : > { %v1752_v40 = vadd.f32 %v1751_v59, %v1750_v19  ;;  %v1759_v33 = vadd.f32 %v1758_v30, %v1757_v9 }
 0x540   : > { %v1955_v0 = vmul.f32 -1.442695, %v1752_v40  ;;  %v1956_v37 = vmul.f32 -1.442695, %v1759_v33 }
 0x542   : > { %2131 = vpow2.f32 %v1955_v0 }
 0x543   : > { %2133 = vpow2.f32 %v1956_v37 }
 0x54c   : > { %v2132_v14 = vpop.eup %2131 }
 0x54d   : > { %v2134_v1 = vpop.eup %2133  ;;  %v1766_v25 = vadd.f32 1.0, %v2132_v14 }
 0x54e   : > { %v1767_v24 = vadd.f32 1.0, %v2134_v1 }
 0x54f   : > { %2135 = vrcp.f32 %v1766_v25 }
 0x550   : > { %2137 = vrcp.f32 %v1767_v24 }
 0x559   : > { %v2136_v28 = vpop.eup %2135 }
 0x55a   : > { %v2138_v16 = vpop.eup %2137  ;;  %v1772_v29 = vmul.f32 %v2136_v28, %v3357_v6  ;;  %v1774_v35 = vmul.f32 %v2136_v28, %v3358_v32  ;;  %v1776_v46 = vmul.f32 %v2136_v28, %v3359_v27  ;;  %v1778_v17 = vmul.f32 %v2136_v28, %v3360_v51 }
 0x55b   : > { %v1773_v34 = vmul.f32 %v2138_v16, %v3361_v39  ;;  %v1775_v50 = vmul.f32 %v2138_v16, %v3362_v8  ;;  %v1777_v42 = vmul.f32 %v2138_v16, %v3363_v31  ;;  %v1779_v61 = vmul.f32 %v2138_v16, %v3364_v23 }
 0x55c   : > { %1780 = vst [vmem:[%s257_s25] sm:$0xff] %v1772_v29  ;;  %1782 = vst [vmem:[%s257_s25 + $0x10] sm:$0xff] %v1774_v35 }
 0x55d   : > { %1784 = vst [vmem:[%s257_s25 + $0x20] sm:$0xff] %v1776_v46  ;;  %1786 = vst [vmem:[%s257_s25 + $0x30] sm:$0xff] %v1778_v17 }
 0x55e   : > { %1781 = vst [vmem:[%s257_s25 + $0x8] sm:$0xff] %v1773_v34  ;;  %1783 = vst [vmem:[%s257_s25 + $0x18] sm:$0xff] %v1775_v50 }
 0x55f   : > { %1785 = vst [vmem:[%s257_s25 + $0x28] sm:$0xff] %v1777_v42  ;;  %1787 = vst [vmem:[%s257_s25 + $0x38] sm:$0xff] %v1779_v61 }
 0x560   : > { %2210 = shalt.err (!%p2207_p7)
}
 0x561   : > { %s2211_s28 = scalar_lea.hbm %s3244_s13, 1024  ;;  %s2215_s17 = scalar_lea.hbm %s3300_s5, 2048 }
 0x562   : > { %p2212_p9 = scmp.ne.s32.totalorder %s3244_s13, %s2211_s28  ;;  %p2216_p5 = scmp.lt.u32.totalorder %s3244_s13, %s3300_s5 }
 0x563   : > { %p2217_p11 = scmp.lt.u32.totalorder %s2215_s17, %s2211_s28  ;;  %p2219_p4 = scmp.lt.u32.totalorder %s2211_s28, %s3244_s13 }
 0x564   : > { %p2213_p2 = pnand %p2212_p9, %p2450_p12 }
 0x565   : > { %p2218_p1 = por %p2217_p11, %p2216_p5 }
 0x566   : > { %p2214_p0 = pneg %p2213_p2 }
 0x567   : > { %p2220_p6 = por %p2219_p4, %p2218_p1 }
 0x569   : > { %p2221_p8 = pnand %p2220_p6, %p2214_p0 }
 0x56b   : > { %2224 = shalt.err (!%p2221_p8)
}
 0x56c   : > { %s2328_s25 = smov 256  }
 0x56d   : > { %2005 = dma.vmem_to_hbm [thread:$0]  (%p2450_p12), %s3250_s12, 1024, %s3244_s13, %s1789_s4, %s2328_s25, %s2328_s25, %s2296_s14  }
 0x56e PF: > { %s1817_s30 = sand.u32 1, %s2255_s18   ;;  %p3365_p10 = scmp.ne.s32.totalorder %s3318_s24, 0 }
 0x56f   : > { %p3366_p13 = scmp.ge.s32.totalorder %s2267_s21, 2  ;;  %s1818_s6 = scalar_lea.sflag [#allocation4], %s1817_s30 }
 0x571   : > { %p2016_p3 = pnand %p3366_p13, %p3365_p10 }
 0x573   : > { %2250 = dma.done.wait (!%p2016_p3), %s1818_s6, 1024  }
 0x574   : > { %2252 = vsyncadd (!%p2016_p3), %s1818_s6, 4294966272  ;;  %p19_p7 = scmp.ge.s32.totalorder %s2415_s29, 4   ;;  %s3367_s18 = smov %s2259_s19 }
 0x575   : > { %s3368_s19 = smov %s2263_s20  ;;  %s3369_s20 = smov %s2446_s26 }
 0x576   : > { %s3370_s21 = smov %s2415_s29  ;;  %21 = sbr.rel (!%p19_p7) target bundleno = 6 (0x6), region = 137 }
 0x57d   :  { %1823 = vsyncpa [#allocation3], 1 }
 0x57e   :  { %1825 = vsyncpa [#allocation3 + $0x1], 1 }
 0x57f   :  { %1826 = vsyncpa [#allocation6], 1 }
 0x580   :  { %1827 = vsyncpa [#allocation4], 1 }
 0x581   :  { %1829 = vsyncpa [#allocation4 + $0x1], 1 }

</bundles_post_ra>
